<compile_context>
chip_gen: v7x
topology: tpu7x:2x2x1
jax: 0.10.0
libtpu: 0.0.40
codegen_flags: <defaults>
</compile_context>

<pallas_src>
import functools

import jax
import jax.numpy as jnp
from jax.experimental import pallas as pl
from jax.experimental.pallas import tpu as pltpu


# ----------------------------------------------------------------------------
# Fused kernel: conv3x3(+BN+ReLU) -> conv1x1(+BN+ReLU) -> partial GAP sum
# ----------------------------------------------------------------------------
def _fused_backbone_kernel(x_ref, w1_ref, b1_ref, w2_ref, b2_ref, o_ref,
                           *, gh, gw):
    """One (batch, row-group) grid step, fully on-chip.

    x_ref : [gh+2, W+2, C]  bf16 padded input row group (1-px halo)
    w1_ref: [9*C, C1]       bf16 3x3 conv weights (im2col order, BN folded)
    b1_ref: [1, C1]         f32 folded BN bias (block 1)
    w2_ref: [C1, C2]        bf16 1x1 conv weights (BN folded)
    b2_ref: [1, C2]         f32 folded BN bias (block 2)
    o_ref : [1, C2]         f32 partial GAP (spatial sum) for this row group
    """
    # On-chip im2col: the 9 shifted views are concatenated ONCE into a single
    # [gh*W, 9C] patch matrix (the only narrow-minor-dim tensor in the body).
    taps = [x_ref[dh:dh + gh, dw:dw + gw, :]
            for dh in range(3) for dw in range(3)]
    patches = jnp.concatenate(taps, axis=-1).reshape(gh * gw, -1)

    # Block 1: 3x3 conv (+ folded BN scale) as ONE bf16 MXU matmul, f32 acc.
    y1 = jnp.dot(patches, w1_ref[...], preferred_element_type=jnp.float32)
    y1 = jnp.maximum(y1 + b1_ref[...], 0.0)

    # Block 2: 1x1 conv (pure channel matmul) + bias + ReLU.
    y2 = jnp.dot(y1.astype(w2_ref.dtype), w2_ref[...],
                 preferred_element_type=jnp.float32)
    y2 = jnp.maximum(y2 + b2_ref[...], 0.0)

    # Partial global-average-pool: spatial sum of this row group (single
    # store per step; final group-sum + 1/(H*W) scale happens in JAX).
    o_ref[...] = jnp.sum(y2, axis=0, keepdims=True)


# ----------------------------------------------------------------------------
# Wrapper around pallas_call
# ----------------------------------------------------------------------------
def fused_backbone(x_nhwc, w1, b1, w2, b2, *, row_groups=1):
    """x_nhwc: [B, H, W, C] -> pooled features [B, C2] (f32)."""
    B, H, W, C = x_nhwc.shape
    kc, c1 = w1.shape
    c2 = w2.shape[-1]
    assert kc == 9 * C, (kc, C)
    G = row_groups
    assert H % G == 0, (H, G)
    gh = H // G

    # bf16 MXU operands (f32 accumulation in-kernel) halve the input DMA bytes.
    xb = x_nhwc.astype(jnp.bfloat16)
    xp = jnp.pad(xb, ((0, 0), (1, 1), (1, 1), (0, 0)))     # SAME padding

    if G == 1:
        # Whole image per grid step: pure reshape, NO extra HBM copy / stack.
        xg = xp[:, None]                                    # [B, 1, H+2, W+2, C]
    else:
        # Row groups with a 1-row halo on each side (only (gh+2)/gh overhead).
        # Used to feed both v7x TensorCores at small batch / cap per-step VMEM.
        xg = jnp.stack(
            [xp[:, g * gh: g * gh + gh + 2] for g in range(G)], axis=1)

    w1b = w1.astype(jnp.bfloat16)
    w2b = w2.astype(jnp.bfloat16)
    b1f = b1.astype(jnp.float32)
    b2f = b2.astype(jnp.float32)

    kernel = functools.partial(_fused_backbone_kernel, gh=gh, gw=W)

    flops = 2 * B * H * W * (9 * C * c1 + c1 * c2)
    bytes_accessed = (2 * (xg.size + w1b.size + w2b.size)
                      + 4 * (b1f.size + b2f.size + B * G * c2))

    out = pl.pallas_call(
        kernel,
        out_shape=jax.ShapeDtypeStruct((B, G, 1, c2), jnp.float32),
        grid_spec=pltpu.PrefetchScalarGridSpec(
            num_scalar_prefetch=0,
            grid=(B, G),
            in_specs=[
                # Per-(batch, row-group) padded input block.
                pl.BlockSpec((None, None, gh + 2, W + 2, C),
                             lambda b, g: (b, g, 0, 0, 0)),
                # Weights / biases: same (full) block every step.
                pl.BlockSpec((9 * C, c1), lambda b, g: (0, 0)),
                pl.BlockSpec((1, c1), lambda b, g: (0, 0)),
                pl.BlockSpec((c1, c2), lambda b, g: (0, 0)),
                pl.BlockSpec((1, c2), lambda b, g: (0, 0)),
            ],
            # Independent partial-sum block per grid step (no carried acc).
            out_specs=pl.BlockSpec((None, None, 1, c2),
                                   lambda b, g: (b, g, 0, 0)),
        ),
        compiler_params=pltpu.CompilerParams(
            # Both axes independent -> megacore / v7x 2-TC sharding.
            dimension_semantics=("parallel", "parallel"),
            # Safe on v5e/v6e/v7x scoped limits; raise on v5e/v6e for very
            # large whole-image tiles if needed.
            vmem_limit_bytes=32 * 1024 * 1024,
        ),
        cost_estimate=pl.CostEstimate(
            flops=flops, transcendentals=0, bytes_accessed=bytes_accessed),
    )(xg, w1b, b1f, w2b, b2f)

    # Tiny final reduction over row groups + GAP scale (pure JAX).
    return out.reshape(B, G, c2).sum(axis=1) * (1.0 / float(H * W))


# ----------------------------------------------------------------------------
# "Module" parameters (frozen, deterministic) and forward
# ----------------------------------------------------------------------------
def make_params(c_in=4, c1=32, c2=64, seed=0):
    key = jax.random.PRNGKey(seed)
    k1, k2, k3, k4, k5, k6 = jax.random.split(key, 6)
    w1 = jax.random.normal(k1, (3 * 3 * c_in, c1), jnp.float32) * 0.1
    s1 = 1.0 + 0.05 * jax.random.normal(k2, (1, c1), jnp.float32)
    b1 = 0.05 * jax.random.normal(k3, (1, c1), jnp.float32)
    w2 = jax.random.normal(k4, (c1, c2), jnp.float32) * 0.1
    s2 = 1.0 + 0.05 * jax.random.normal(k5, (1, c2), jnp.float32)
    b2 = 0.05 * jax.random.normal(k6, (1, c2), jnp.float32)
    return dict(w1=w1, s1=s1, b1=b1, w2=w2, s2=s2, b2=b2)


def base_backbone_forward(x_nchw, params, *, row_groups=1):
    """Equivalent of BaseBackbone.forward: x (NCHW) -> pooled features [B, C2]."""
    x = jnp.transpose(x_nchw, (0, 2, 3, 1))                 # NCHW -> NHWC
    # Fold BN scale into the conv weights (kernel epilogue = +bias, ReLU only).
    w1 = params["w1"] * params["s1"]                         # [9*C, C1]
    w2 = params["w2"] * params["s2"]                         # [C1, C2]
    return fused_backbone(x, w1, params["b1"], w2, params["b2"],
                          row_groups=row_groups)


# ----------------------------------------------------------------------------
# Reference (pure JAX) mirroring the kernel's bf16-operand / f32-accum math
# ----------------------------------------------------------------------------
def reference_forward(x_nchw, params):
    x = jnp.transpose(x_nchw, (0, 2, 3, 1)).astype(jnp.bfloat16)
    B, H, W, C = x.shape
    xp = jnp.pad(x, ((0, 0), (1, 1), (1, 1), (0, 0)))
    cols = [xp[:, dh:dh + H, dw:dw + W, :] for dh in range(3) for dw in range(3)]
    patches = jnp.concatenate(cols, axis=-1).reshape(B * H * W, 9 * C)
    w1 = (params["w1"] * params["s1"]).astype(jnp.bfloat16)
    w2 = (params["w2"] * params["s2"]).astype(jnp.bfloat16)
    y1 = jnp.maximum(
        jnp.dot(patches, w1, preferred_element_type=jnp.float32)
        + params["b1"], 0.0)
    y2 = jnp.maximum(
        jnp.dot(y1.astype(jnp.bfloat16), w2, preferred_element_type=jnp.float32)
        + params["b2"], 0.0)
    return jnp.mean(y2.reshape(B, H * W, -1), axis=1)


if __name__ == "__main__":
    B, C, H, W = 2, 4, 16, 16
    key = jax.random.PRNGKey(0)
    x = jax.random.normal(key, (B, C, H, W), jnp.float32)

    params = make_params(c_in=C, c1=32, c2=64, seed=0)
    ref = reference_forward(x, params)

    # Default: whole image per grid step, grid = (B, 1).
    out = jax.block_until_ready(base_backbone_forward(x, params))
    assert out.shape == (B, 64), out.shape
    err = float(jnp.max(jnp.abs(out - ref)))
    assert jnp.allclose(out, ref, atol=2e-3, rtol=2e-3), err

    # Row-group-split variant (grid = (B, 2), both axes parallel): feeds both
    # v7x TensorCores at small batch; must give the same pooled features.
    out2 = jax.block_until_ready(base_backbone_forward(x, params, row_groups=2))
    err2 = float(jnp.max(jnp.abs(out2 - ref)))
    assert jnp.allclose(out2, ref, atol=2e-3, rtol=2e-3), err2

    print("KERNEL_OK")
</pallas_src>

<mosaic_0001>
module attributes {stable_mosaic.version = 11 : i64} {
  func.func @_fused_backbone_kernel(%arg0: i32, %arg1: i32, %arg2: memref<1x1x18x18x4xbf16, #tpu.memory_space<vmem>>, %arg3: memref<36x32xbf16, #tpu.memory_space<vmem>>, %arg4: memref<1x32xf32, #tpu.memory_space<vmem>>, %arg5: memref<32x64xbf16, #tpu.memory_space<vmem>>, %arg6: memref<1x64xf32, #tpu.memory_space<vmem>>, %arg7: memref<1x1x1x64xf32, #tpu.memory_space<vmem>>) attributes {dimension_semantics = [#tpu.dimension_semantics<parallel>, #tpu.dimension_semantics<parallel>], iteration_bounds = array<i64: 2, 1>, scalar_prefetch = 0 : i64, scratch_operands = 0 : i64, tpu.core_type = #tpu.core_type<tc>, window_params = [{transform_indices = @transform_0, window_bounds = array<i64: 1, 1, 18, 18, 4>}, {pipeline_mode = #tpu.pipeline_mode<synchronous>, transform_indices = @transform_1, window_bounds = array<i64: 36, 32>}, {pipeline_mode = #tpu.pipeline_mode<synchronous>, transform_indices = @transform_2, window_bounds = array<i64: 1, 32>}, {pipeline_mode = #tpu.pipeline_mode<synchronous>, transform_indices = @transform_3, window_bounds = array<i64: 32, 64>}, {pipeline_mode = #tpu.pipeline_mode<synchronous>, transform_indices = @transform_4, window_bounds = array<i64: 1, 64>}, {transform_indices = @transform_5, window_bounds = array<i64: 1, 1, 1, 64>}]} {
    %c0 = arith.constant 0 : index
    %c0_0 = arith.constant 0 : index
    %c0_1 = arith.constant 0 : index
    %c0_2 = arith.constant 0 : index
    %c0_3 = arith.constant 0 : index
    %0 = vector.load %arg2[%c0, %c0_0, %c0_1, %c0_2, %c0_3] : memref<1x1x18x18x4xbf16, #tpu.memory_space<vmem>>, vector<1x1x16x16x4xbf16>
    %1 = vector.shape_cast %0 : vector<1x1x16x16x4xbf16> to vector<16x16x4xbf16>
    %c0_4 = arith.constant 0 : index
    %c0_5 = arith.constant 0 : index
    %c0_6 = arith.constant 0 : index
    %c1 = arith.constant 1 : index
    %c0_7 = arith.constant 0 : index
    %2 = vector.load %arg2[%c0_4, %c0_5, %c0_6, %c1, %c0_7] : memref<1x1x18x18x4xbf16, #tpu.memory_space<vmem>>, vector<1x1x16x16x4xbf16>
    %3 = vector.shape_cast %2 : vector<1x1x16x16x4xbf16> to vector<16x16x4xbf16>
    %c0_8 = arith.constant 0 : index
    %c0_9 = arith.constant 0 : index
    %c0_10 = arith.constant 0 : index
    %c2 = arith.constant 2 : index
    %c0_11 = arith.constant 0 : index
    %4 = vector.load %arg2[%c0_8, %c0_9, %c0_10, %c2, %c0_11] : memref<1x1x18x18x4xbf16, #tpu.memory_space<vmem>>, vector<1x1x16x16x4xbf16>
    %5 = vector.shape_cast %4 : vector<1x1x16x16x4xbf16> to vector<16x16x4xbf16>
    %c0_12 = arith.constant 0 : index
    %c0_13 = arith.constant 0 : index
    %c1_14 = arith.constant 1 : index
    %c0_15 = arith.constant 0 : index
    %c0_16 = arith.constant 0 : index
    %6 = vector.load %arg2[%c0_12, %c0_13, %c1_14, %c0_15, %c0_16] : memref<1x1x18x18x4xbf16, #tpu.memory_space<vmem>>, vector<1x1x16x16x4xbf16>
    %7 = vector.shape_cast %6 : vector<1x1x16x16x4xbf16> to vector<16x16x4xbf16>
    %c0_17 = arith.constant 0 : index
    %c0_18 = arith.constant 0 : index
    %c1_19 = arith.constant 1 : index
    %c1_20 = arith.constant 1 : index
    %c0_21 = arith.constant 0 : index
    %8 = vector.load %arg2[%c0_17, %c0_18, %c1_19, %c1_20, %c0_21] : memref<1x1x18x18x4xbf16, #tpu.memory_space<vmem>>, vector<1x1x16x16x4xbf16>
    %9 = vector.shape_cast %8 : vector<1x1x16x16x4xbf16> to vector<16x16x4xbf16>
    %c0_22 = arith.constant 0 : index
    %c0_23 = arith.constant 0 : index
    %c1_24 = arith.constant 1 : index
    %c2_25 = arith.constant 2 : index
    %c0_26 = arith.constant 0 : index
    %10 = vector.load %arg2[%c0_22, %c0_23, %c1_24, %c2_25, %c0_26] : memref<1x1x18x18x4xbf16, #tpu.memory_space<vmem>>, vector<1x1x16x16x4xbf16>
    %11 = vector.shape_cast %10 : vector<1x1x16x16x4xbf16> to vector<16x16x4xbf16>
    %c0_27 = arith.constant 0 : index
    %c0_28 = arith.constant 0 : index
    %c2_29 = arith.constant 2 : index
    %c0_30 = arith.constant 0 : index
    %c0_31 = arith.constant 0 : index
    %12 = vector.load %arg2[%c0_27, %c0_28, %c2_29, %c0_30, %c0_31] : memref<1x1x18x18x4xbf16, #tpu.memory_space<vmem>>, vector<1x1x16x16x4xbf16>
    %13 = vector.shape_cast %12 : vector<1x1x16x16x4xbf16> to vector<16x16x4xbf16>
    %c0_32 = arith.constant 0 : index
    %c0_33 = arith.constant 0 : index
    %c2_34 = arith.constant 2 : index
    %c1_35 = arith.constant 1 : index
    %c0_36 = arith.constant 0 : index
    %14 = vector.load %arg2[%c0_32, %c0_33, %c2_34, %c1_35, %c0_36] : memref<1x1x18x18x4xbf16, #tpu.memory_space<vmem>>, vector<1x1x16x16x4xbf16>
    %15 = vector.shape_cast %14 : vector<1x1x16x16x4xbf16> to vector<16x16x4xbf16>
    %c0_37 = arith.constant 0 : index
    %c0_38 = arith.constant 0 : index
    %c2_39 = arith.constant 2 : index
    %c2_40 = arith.constant 2 : index
    %c0_41 = arith.constant 0 : index
    %16 = vector.load %arg2[%c0_37, %c0_38, %c2_39, %c2_40, %c0_41] : memref<1x1x18x18x4xbf16, #tpu.memory_space<vmem>>, vector<1x1x16x16x4xbf16>
    %17 = vector.shape_cast %16 : vector<1x1x16x16x4xbf16> to vector<16x16x4xbf16>
    %18 = tpu.concatenate %1, %3, %5, %7, %9, %11, %13, %15, %17 in 2 : vector<16x16x4xbf16>, vector<16x16x4xbf16>, vector<16x16x4xbf16>, vector<16x16x4xbf16>, vector<16x16x4xbf16>, vector<16x16x4xbf16>, vector<16x16x4xbf16>, vector<16x16x4xbf16>, vector<16x16x4xbf16> -> vector<16x16x36xbf16>
    %19 = vector.shape_cast %18 : vector<16x16x36xbf16> to vector<256x36xbf16>
    %c0_42 = arith.constant 0 : index
    %c0_43 = arith.constant 0 : index
    %20 = vector.load %arg3[%c0_42, %c0_43] : memref<36x32xbf16, #tpu.memory_space<vmem>>, vector<36x32xbf16>
    %cst = arith.constant dense<0.000000e+00> : vector<256x32xf32>
    %21 = tpu.matmul %19, %20, %cst {dimension_numbers = #tpu.dot_dimension_numbers<[1], [0], [0], [1], [0, 0, 1, 1], [], []>} : vector<256x36xbf16>, vector<36x32xbf16>, vector<256x32xf32> -> vector<256x32xf32>
    %c0_44 = arith.constant 0 : index
    %c0_45 = arith.constant 0 : index
    %22 = vector.load %arg4[%c0_44, %c0_45] : memref<1x32xf32, #tpu.memory_space<vmem>>, vector<1x32xf32>
    %23 = vector.broadcast %22 : vector<1x32xf32> to vector<256x32xf32>
    %24 = arith.addf %21, %23 : vector<256x32xf32>
    %cst_46 = arith.constant 0.000000e+00 : f32
    %25 = vector.broadcast %cst_46 : f32 to vector<256x32xf32>
    %26 = arith.maximumf %24, %25 : vector<256x32xf32>
    %27 = arith.truncf %26 : vector<256x32xf32> to vector<256x32xbf16>
    %c0_47 = arith.constant 0 : index
    %c0_48 = arith.constant 0 : index
    %28 = vector.load %arg5[%c0_47, %c0_48] : memref<32x64xbf16, #tpu.memory_space<vmem>>, vector<32x64xbf16>
    %cst_49 = arith.constant dense<0.000000e+00> : vector<256x64xf32>
    %29 = tpu.matmul %27, %28, %cst_49 {dimension_numbers = #tpu.dot_dimension_numbers<[1], [0], [0], [1], [0, 0, 1, 1], [], []>} : vector<256x32xbf16>, vector<32x64xbf16>, vector<256x64xf32> -> vector<256x64xf32>
    %c0_50 = arith.constant 0 : index
    %c0_51 = arith.constant 0 : index
    %30 = vector.load %arg6[%c0_50, %c0_51] : memref<1x64xf32, #tpu.memory_space<vmem>>, vector<1x64xf32>
    %31 = vector.broadcast %30 : vector<1x64xf32> to vector<256x64xf32>
    %32 = arith.addf %29, %31 : vector<256x64xf32>
    %cst_52 = arith.constant 0.000000e+00 : f32
    %33 = vector.broadcast %cst_52 : f32 to vector<256x64xf32>
    %34 = arith.maximumf %32, %33 : vector<256x64xf32>
    %cst_53 = arith.constant dense<0.000000e+00> : vector<64xf32>
    %35 = vector.multi_reduction <add>, %34, %cst_53 [0] : vector<256x64xf32> to vector<64xf32>
    %36 = vector.shape_cast %35 : vector<64xf32> to vector<1x64xf32>
    %c0_54 = arith.constant 0 : index
    %c0_55 = arith.constant 0 : index
    %c0_56 = arith.constant 0 : index
    %c0_57 = arith.constant 0 : index
    %37 = vector.load %arg7[%c0_54, %c0_55, %c0_56, %c0_57] : memref<1x1x1x64xf32, #tpu.memory_space<vmem>>, vector<1x1x1x64xf32>
    %38 = vector.shape_cast %37 : vector<1x1x1x64xf32> to vector<1x64xf32>
    %39 = vector.shape_cast %36 : vector<1x64xf32> to vector<1x1x1x64xf32>
    tpu.vector_store %arg7[%c0_54, %c0_55, %c0_56, %c0_57], %39 {strides = array<i32>} : memref<1x1x1x64xf32, #tpu.memory_space<vmem>>, vector<1x1x1x64xf32>,
    return
  }
  func.func @transform_0(%arg0: i32, %arg1: i32) -> (i32, i32, i32, i32, i32) {
    %c0_i32 = arith.constant 0 : i32
    %c0_i32_0 = arith.constant 0 : i32
    %c0_i32_1 = arith.constant 0 : i32
    %c0_i32_2 = arith.constant 0 : i32
    return %arg0, %arg1, %c0_i32, %c0_i32_0, %c0_i32_1 : i32, i32, i32, i32, i32
  }
  func.func @transform_1(%arg0: i32, %arg1: i32) -> (i32, i32) {
    %c0_i32 = arith.constant 0 : i32
    %c0_i32_0 = arith.constant 0 : i32
    %c0_i32_1 = arith.constant 0 : i32
    return %c0_i32, %c0_i32_0 : i32, i32
  }
  func.func @transform_2(%arg0: i32, %arg1: i32) -> (i32, i32) {
    %c0_i32 = arith.constant 0 : i32
    %c0_i32_0 = arith.constant 0 : i32
    %c0_i32_1 = arith.constant 0 : i32
    return %c0_i32, %c0_i32_0 : i32, i32
  }
  func.func @transform_3(%arg0: i32, %arg1: i32) -> (i32, i32) {
    %c0_i32 = arith.constant 0 : i32
    %c0_i32_0 = arith.constant 0 : i32
    %c0_i32_1 = arith.constant 0 : i32
    return %c0_i32, %c0_i32_0 : i32, i32
  }
  func.func @transform_4(%arg0: i32, %arg1: i32) -> (i32, i32) {
    %c0_i32 = arith.constant 0 : i32
    %c0_i32_0 = arith.constant 0 : i32
    %c0_i32_1 = arith.constant 0 : i32
    return %c0_i32, %c0_i32_0 : i32, i32
  }
  func.func @transform_5(%arg0: i32, %arg1: i32) -> (i32, i32, i32, i32) {
    %c0_i32 = arith.constant 0 : i32
    %c0_i32_0 = arith.constant 0 : i32
    %c0_i32_1 = arith.constant 0 : i32
    return %arg0, %arg1, %c0_i32, %c0_i32_0 : i32, i32, i32, i32
  }
}

</mosaic_0001>

<bundles_post_ra>
// kernel: tpu_custom_call.1
= control target key start
LH: loop header
LB: loop body
LE: loop exit
PB: predicated region body
PF: predicated region fallthrough
CT: control target
= control target key end

     0   :  { %10 = vsyncpa [#allocation3], 0  ;;  %s4973_s0 = inlined_call_operand.vmem [shape: bf16[2,1,18,18,4], index: 0, kind: input, shape index: {}]   ;;  %s4974_s1 = inlined_call_operand.vmem [shape: bf16[36,32], index: 1, kind: input, shape index: {}]   ;;  %s4975_s2 = inlined_call_operand.vmem [shape: f32[1,32], index: 2, kind: input, shape index: {}]   ;;  %s4976_s3 = inlined_call_operand.vmem [shape: bf16[32,64], index: 3, kind: input, shape index: {}]   ;;  %s4977_s4 = inlined_call_operand.vmem [shape: f32[1,64], index: 4, kind: input, shape index: {}]   ;;  %s4978_s5 = inlined_call_operand.hbm [shape: f32[2,1,1,64], index: 5, kind: output, shape index: {}]  }
   0x1   :  { %12 = vsyncpa [#allocation3 + $0x1], 0  ;;  %s3675_s18 = smov 0   ;;  %s3677_s19 = smov 0  }
   0x2   :  { %s3679_s20 = smov 0   ;;  %s3681_s21 = smov 0  }
   0x3   :  { %s3683_s22 = smov 0   ;;  %s3685_s23 = smov 0  }
   0x4 LB: > { %s2911_s24 = sadd.s32 4294967295, %s3634_s23   ;;  %s2912_s25 = sadd.s32 4294967294, %s3634_s23   ;;  %s3634_s23 = sphi %s3685_s23, %s18_s23   ;;  %s3630_s22 = sphi %s3683_s22, %s4985_s22   ;;  %s3626_s21 = sphi %s3681_s21, %s4984_s21   ;;  %s3622_s20 = sphi %s3679_s20, %s4983_s20   ;;  %s3618_s19 = sphi %s3677_s19, %s4982_s19   ;;  %s3614_s18 = sphi %s3675_s18, %s4981_s18  }
   0x5   : > { %s30_s26 = sadd.s32 1, %s3630_s22  ;;  %s151_s27 = sadd.s32 1, %s3622_s20 }
   0x6   : > { %p32_p0 = scmp.ge.s32.totalorder %s30_s26, 2  ;;  %p161_p1 = scmp.ne.s32.totalorder %s3622_s20, %s3618_s19 }
   0x7   : > { %p162_p2 = scmp.eq.s32.totalorder %s2911_s24, 1  ;;  %p167_p3 = scmp.ne.s32.totalorder %s3618_s19, %s3614_s18 }
   0x8   : > { %s4987_s26 = smov (%p32_p0, %s30_s26), 0  ;;  %p168_p5 = scmp.eq.s32.totalorder %s2912_s25, 1 }
   0x9   : > { %p3715_p4 = por %p162_p2, %p161_p1  ;;  %s146_s29 = ssub.s32 %s3630_s22, %s4987_s26 }
   0xa   : > { %p2915_p6 = scmp.ge.s32.totalorder %s3634_s23, 1  ;;  %p149_p7 = scmp.eq.s32.totalorder %s146_s29, 0 }
   0xb   : > { %p3722_p8 = por %p168_p5, %p167_p3  ;;  %p210_p9 = scmp.lt.s32.totalorder %s3634_s23, 3 }
   0xc   : > { %s3728_s6 = scalar_select %p149_p7, %s3622_s20, %s151_s27  }
   0xd   : > { %p211_p10 = pnand %p2915_p6, %p210_p9 }
   0xe   : > { %p241_p11 = scmp.lt.s32.totalorder (!%p211_p10), %s3626_s21, 1  ;;  %vm846_vm0 = vcmask (!%p211_p10), 1046528   ;;  %s3636_s12 = smov (!%p211_p10), 12   ;;  %vm573_vm1 = vsmask.f32 (!%p211_p10), 7424  ;;  %v3485_v57 = vld [vmem:[%s4974_s1] sm:$0xff] (!%p211_p10)  }
   0xf   : > { %214 = sbr.rel (%p211_p10) target bundleno = 877 (0x36d), region = 40  ;;  %s3637_s13 = smov (!%p211_p10), 20   ;;  %3268 = vmatprep.subr.bf16.mxu0 (!%p211_p10), %v3485_v57  ;;  %vm2275_vm2 = vcmask (!%p211_p10), 1041408   ;;  %vm1951_vm3 = vcmask (!%p211_p10), 31744   ;;  %vm1984_vm4 = vcmask (!%p211_p10), 64512   ;;  %vm2017_vm5 = vcmask (!%p211_p10), 97280  }
  0x10   : > { %s3638_s14 = smov (!%p211_p10), 8   ;;  %s3639_s17 = smov (!%p211_p10), 4   ;;  %3269 = vmatpush3.bf16.msra.mxu0 (!%p211_p10), %v3485_v57  ;;  %vm2050_vm6 = vcmask (!%p211_p10), 130048   ;;  %vm2083_vm7 = vcmask (!%p211_p10), 162816   ;;  %vm2116_vm8 = vcmask (!%p211_p10), 195584   ;;  %vm2149_vm9 = vcmask (!%p211_p10), 228352  }
  0x11   : > { %s3640_s27 = smov (!%p211_p10), 16   ;;  %s3641_s29 = smov (!%p211_p10), 24   ;;  %vm2182_vm10 = vcmask (!%p211_p10), 261120   ;;  %vm2242_vm11 = vcmask (!%p211_p10), 293888   ;;  %vm2752_vm12 = vcmask (!%p211_p10), 523264   ;;  %vm2822_vm13 = vcmask (!%p211_p10), 516096  }
  0x12   : > { %s239_s25 = sand.u32 (!%p211_p10), 1, %s3618_s19  }
  0x16   : > { %s242_s7 = scalar_select %p241_p11, %s3626_s21, 1 }
  0x18   : > { %s3343_s8 = smul.u32 216, %s242_s7  ;;  %s3642_s7 = smov 28  }
  0x1a   : > { %s3735_s11 = scalar_lea.vmem %s4973_s0, %s3343_s8  ;;  %s3643_s8 = smov 32  }
  0x1b   : > { %v2919_v0 = vld [vmem:[%s3735_s11 + $0x18] sm:$0xf]  ;;  %v2920_v1 = vld [vmem:[%s3735_s11 + $0x1c] sm:$0xf]  ;;  %v2917_v5 = vld [vmem:[%s3735_s11 + $0xc] sm:$0xf] }
  0x1c   : > { %v2966_v2 = vld [vmem:[%s3735_s11 + $0x18] sm:$0xe]  ;;  %v3740_v3 = vcombine.low %v2919_v0, %v2920_v1  ;;  %v2918_v6 = vld [vmem:[%s3735_s11 + $0x10] sm:$0xf]  ;;  %v2965_v7 = vld [vmem:[%s3735_s11 + $0xc] sm:$0xe] }
  0x1d   : > { %v3126_v4 = vcombine.low %v2966_v2, %v2920_v1  ;;  %v3745_v8 = vcombine.low %v2917_v5, %v2918_v6  ;;  %v3125_v9 = vcombine.low %v2965_v7, %v2918_v6  ;;  %v3748_v10 = vld [vmem:[%s3735_s11 + $0x14] ss:$0 sps:$4 sm:$0x11]   ;;  %v252_v12 = vld [vmem:[%s3735_s11 + $0x4] sm:$0xf] }
  0x1e   : > { %1009 = vrot.lane.b32.xlu1 %v3740_v3, %s3636_s12  ;;  %v1102_v11 = vshll.u32 %v3740_v3, 16  ;;  %v1360_v15 = vrot.slane %v3748_v10, 1  ;;  %v299_v16 = vld [vmem:[%s3735_s11] sm:$0xe]  ;;  %v1100_v21 = vshrl.u32 %v3740_v3, 16  ;;  %v1095_v60 = vshll.u32 %v3748_v10, 16 }
  0x1f   : > { %1007 = vrot.lane.b32.xlu0 %v3745_v8, %s3636_s12  ;;  %v1090_v13 = vshll.u32 %v3745_v8, 16  ;;  %v1359_v14 = vrot.slane %v3125_v9, 1  ;;  %v1362_v17 = vrot.slane %v3126_v4, 1  ;;  %v3412_v18 = vld [vmem:[%s3735_s11 + $0x8] ss:$0 sps:$4 sm:$0x11]   ;;  %v3077_v19 = vcombine.low %v299_v16, %v252_v12 }
  0x20   : > { %v251_v20 = vld [vmem:[%s3735_s11] sm:$0xf]  ;;  %v253_v24 = vld [vmem:[%s3735_s11 + $0xc] sm:$0xf]  ;;  %v254_v25 = vld [vmem:[%s3735_s11 + $0x10] sm:$0xf] }
  0x21   : > { %v1361_v22 = vsel %vm846_vm0, %v1359_v14, %v1360_v15  ;;  %v3763_v23 = vcombine.low %v251_v20, %v252_v12  ;;  %v847_v26 = vrot.slane %v3077_v19, 1  ;;  %v848_v27 = vrot.slane %v3412_v18, 1  ;;  %v300_v28 = vld [vmem:[%s3735_s11 + $0xc] sm:$0xe]  ;;  %v2983_v43 = vld [vmem:[%s3735_s11 + $0x24] sm:$0xf] }
  0x22   : > { %v3768_v29 = vcombine.low %v253_v24, %v254_v25  ;;  %v582_v30 = vshll.u32 %v3412_v18, 16  ;;  %v3416_v31 = vld [vmem:[%s3735_s11 + $0x14] ss:$0 sps:$4 sm:$0x11]   ;;  %v3078_v32 = vcombine.low %v300_v28, %v254_v25  ;;  %v1104_v35 = vrot.slane %v1102_v11, 1  ;;  %v3490_v12 = vld [vmem:[%s4974_s1 + $0x8] sm:$0xff]  }
  0x23   : > { %1407 = vrot.lane.b32.xlu0 %v1361_v22, %s3637_s13  ;;  %v575_v33 = vshrl.u32 %v3763_v23, 16  ;;  %v577_v34 = vshll.u32 %v3763_v23, 16  ;;  %v849_v36 = vsel %vm846_vm0, %v847_v26, %v848_v27  ;;  %v3418_v38 = vld [vmem:[%s3735_s11 + $0x20] ss:$0 sps:$4 sm:$0x11]   ;;  %v851_v40 = vrot.slane %v3416_v31, 1  ;;  %3270 = vmatprep.subr.bf16.mxu0 %v3490_v12 }
  0x24   : > { %v584_v37 = vrot.slane %v582_v30, 1  ;;  %895 = vrot.lane.b32.xlu1 %v849_v36, %s3638_s14  ;;  %v850_v39 = vrot.slane %v3078_v32, 1  ;;  %v587_v42 = vshrl.u32 %v3768_v29, 16  ;;  %v1363_v44 = vrot.slane %v3418_v38, 1  ;;  %v3781_v48 = vld [vmem:[%s3735_s11 + $0x28] sm:$0xf]  ;;  %3271 = vmatpush3.bf16.msra.mxu0 %v3490_v12 }
  0x25   : > { %v579_v41 = vrot.slane %v577_v34, 1  ;;  %v589_v45 = vshll.u32 %v3768_v29, 16  ;;  %v594_v46 = vshll.u32 %v3416_v31, 16  ;;  %v1107_v47 = vshll.u32 %v3418_v38, 16  ;;  %v2981_v53 = vld [vmem:[%s3735_s11 + $0x18] sm:$0xf] }
  0x26   : > { %v852_v49 = vsel %vm846_vm0, %v850_v39, %v851_v40  ;;  %v1088_v51 = vshrl.u32 %v3745_v8, 16  ;;  %v1092_v52 = vrot.slane %v1090_v13, 1  ;;  %v2982_v56 = vld [vmem:[%s3735_s11 + $0x1c] sm:$0xf]  ;;  %v1105_v59 = vor.u32 %v1104_v35, %v1100_v21  ;;  %v3029_v6 = vld [vmem:[%s3735_s11 + $0x18] sm:$0xe] }
  0x27   : > { %v580_v50 = vor.u32 %v579_v41, %v575_v33  ;;  %v591_v54 = vrot.slane %v589_v45, 1  ;;  %v596_v55 = vrot.slane %v594_v46, 1  ;;  %v3142_v61 = vcombine.low %v2983_v43, %v3781_v48  ;;  %v3797_v2 = vld [vmem:[%s3735_s11 + $0x2c] ss:$0 sps:$4 sm:$0x11]  }
  0x28   : > { %897 = vrot.lane.b32.xlu1 %v852_v49, %s3638_s14  ;;  %v1364_v62 = vsel %vm846_vm0, %v1362_v17, %v1363_v44  ;;  %v1109_v0 = vrot.slane %v1107_v47, 1  ;;  %v3141_v1 = vcombine.low %v2981_v53, %v2982_v56  ;;  %v1093_v3 = vor.u32 %v1092_v52, %v1088_v51  ;;  %v3801_v7 = vld [vmem:[%s3735_s11 + $0x20] ss:$0 sps:$4 sm:$0x11]   ;;  %v255_v11 = vld [vmem:[%s3735_s11 + $0x18] sm:$0xf] }
  0x29   : > { %v585_v58 = vsel %vm573_vm1, %v580_v50, %v584_v37  ;;  %v592_v63 = vor.u32 %v591_v54, %v587_v42  ;;  %v1097_v4 = vrot.slane %v1095_v60, 1  ;;  %v1614_v5 = vshll.u32 %v3142_v61, 16  ;;  %v3811_v15 = vld [vmem:[%s3735_s11 + $0x1c] sm:$0xf]  ;;  %v257_v24 = vld [vmem:[%s3735_s11 + $0x24] sm:$0xf] }
  0x2a   : > { %766 = vrot.lane.b32.xlu0 %v585_v58, %s3639_s17  ;;  %v1602_v9 = vshll.u32 %v3141_v1, 16  ;;  %v1612_v10 = vshrl.u32 %v3142_v61, 16  ;;  %v1619_v14 = vshll.u32 %v3797_v2, 16  ;;  %v1110_v16 = vsel %vm573_vm1, %v1105_v59, %v1109_v0  ;;  %v3819_v19 = vld [vmem:[%s3735_s11 + $0x20] ss:$0 sps:$4 sm:$0x11]  }
  0x2b   : > { %v597_v8 = vsel %vm573_vm1, %v592_v63, %v596_v55  ;;  %v1616_v13 = vrot.slane %v1614_v5, 1  ;;  %v1600_v17 = vshrl.u32 %v3141_v1, 16  ;;  %v3816_v18 = vcombine.low %v255_v11, %v3811_v15  ;;  %v258_v25 = vld [vmem:[%s3735_s11 + $0x28] sm:$0xf]  ;;  %v3030_v39 = vld [vmem:[%s3735_s11 + $0x24] sm:$0xe] }
  0x2c   : > { %1409 = vrot.lane.b32.xlu1 %v1364_v62, %s3637_s13  ;;  %v1098_v20 = vsel %vm573_vm1, %v1093_v3, %v1097_v4  ;;  %v1604_v21 = vrot.slane %v1602_v9, 1  ;;  %v1607_v22 = vshll.u32 %v3801_v7, 16  ;;  %v3173_v26 = vcombine.low %v3029_v6, %v2982_v56  ;;  %v3428_v35 = vld [vmem:[%s3735_s11 + $0x2c] ss:$0 sps:$4 sm:$0x11]  }
  0x2d   : > { %v601_v27 = vshll.u32 %v3816_v18, 16  ;;  %v1617_v28 = vor.u32 %v1616_v13, %v1612_v10  ;;  %v1621_v30 = vrot.slane %v1619_v14, 1  ;;  %v606_v31 = vshll.u32 %v3819_v19, 16  ;;  %v302_v44 = vld [vmem:[%s3735_s11 + $0x24] sm:$0xe] }
  0x2e   : > { %768 = vrot.lane.b32.xlu0 %v597_v8, %s3639_s17  ;;  %v3828_v32 = vcombine.low %v257_v24, %v258_v25  ;;  %v599_v33 = vshrl.u32 %v3816_v18, 16  ;;  %v1605_v36 = vor.u32 %v1604_v21, %v1600_v17  ;;  %v1609_v37 = vrot.slane %v1607_v22, 1  ;;  %v301_v50 = vld [vmem:[%s3735_s11 + $0x18] sm:$0xe]  ;;  %v2923_v53 = vld [vmem:[%s3735_s11 + $0x30] sm:$0xf] }
  0x2f   : > { %v603_v34 = vrot.slane %v601_v27, 1  ;;  %v1622_v40 = vsel %vm573_vm1, %v1617_v28, %v1621_v30  ;;  %v608_v41 = vrot.slane %v606_v31, 1  ;;  %v1871_v42 = vrot.slane %v3173_v26, 1  ;;  %v2924_v54 = vld [vmem:[%s3735_s11 + $0x34] sm:$0xf] }
  0x30   : > { %1281 = vrot.lane.b32.xlu1 %v1110_v16, %s3640_s27  ;;  %v613_v38 = vshll.u32 %v3828_v32, 16  ;;  %v1872_v43 = vrot.slane %v3801_v7, 1  ;;  %v611_v46 = vshrl.u32 %v3828_v32, 16  ;;  %v618_v49 = vshll.u32 %v3428_v35, 16  ;;  %v2921_v55 = vld [vmem:[%s3735_s11 + $0x24] sm:$0xf] }
  0x31   : > { %v604_v45 = vor.u32 %v603_v34, %v599_v33  ;;  %v3174_v51 = vcombine.low %v3030_v39, %v3781_v48  ;;  %v1610_v52 = vsel %vm573_vm1, %v1605_v36, %v1609_v37  ;;  %v2922_v56 = vld [vmem:[%s3735_s11 + $0x28] sm:$0xf]  ;;  %v3080_v58 = vcombine.low %v302_v44, %v258_v25  ;;  %v3856_v3 = vld [vmem:[%s3735_s11 + $0x38] ss:$0 sps:$4 sm:$0x11]  }
  0x32   : > { %1279 = vrot.lane.b32.xlu0 %v1098_v20, %s3640_s27  ;;  %v615_v47 = vrot.slane %v613_v38, 1  ;;  %v1873_v57 = vsel %vm846_vm0, %v1871_v42, %v1872_v43  ;;  %v3096_v48 = vcombine.low %v2923_v53, %v2924_v54  ;;  %v1875_v63 = vrot.slane %v3797_v2, 1  ;;  %v3436_v11 = vld [vmem:[%s3735_s11 + $0x2c] ss:$0 sps:$4 sm:$0x11]  }
  0x33   : > { %v609_v59 = vsel %vm573_vm1, %v604_v45, %v608_v41  ;;  %v1874_v62 = vrot.slane %v3174_v51, 1  ;;  %v3079_v0 = vcombine.low %v301_v50, %v3811_v15  ;;  %v856_v5 = vrot.slane %v3080_v58, 1  ;;  %v2968_v12 = vld [vmem:[%s3735_s11 + $0x30] sm:$0xe]  ;;  %v2967_v13 = vld [vmem:[%s3735_s11 + $0x24] sm:$0xe] }
  0x34   : > { %1521 = vrot.lane.b32.xlu1 %v3142_v61, %s3641_s29  ;;  %v616_v60 = vor.u32 %v615_v47, %v611_v46  ;;  %v620_v61 = vrot.slane %v618_v49, 1  ;;  %v857_v6 = vrot.slane %v3428_v35, 1  ;;  %v1126_v7 = vshll.u32 %v3096_v48, 16  ;;  %v2987_v21 = vld [vmem:[%s3735_s11 + $0x3c] sm:$0xf] }
  0x35   : > { %v1876_v2 = vsel %vm846_vm0, %v1874_v62, %v1875_v63  ;;  %v853_v8 = vrot.slane %v3079_v0, 1  ;;  %v854_v9 = vrot.slane %v3819_v19, 1  ;;  %v1124_v14 = vshrl.u32 %v3096_v48, 16  ;;  %v3871_v22 = vld [vmem:[%s3735_s11 + $0x40] sm:$0xf] }
  0x36   : > { %1519 = vrot.lane.b32.xlu0 %v3141_v1, %s3641_s29  ;;  %v3095_v1 = vcombine.low %v2921_v55, %v2922_v56  ;;  %v621_v4 = vsel %vm573_vm1, %v616_v60, %v620_v61  ;;  %v1131_v15 = vshll.u32 %v3856_v3, 16  ;;  %v858_v16 = vsel %vm846_vm0, %v856_v5, %v857_v6  ;;  %v2985_v26 = vld [vmem:[%s3735_s11 + $0x30] sm:$0xf]  ;;  %v2986_v27 = vld [vmem:[%s3735_s11 + $0x34] sm:$0xf] }
  0x37   : > { %v1128_v17 = vrot.slane %v1126_v7, 1  ;;  %v855_v19 = vsel %vm846_vm0, %v853_v8, %v854_v9  ;;  %v1119_v25 = vshll.u32 %v3436_v11, 16  ;;  %v3128_v28 = vcombine.low %v2968_v12, %v2924_v54  ;;  %v259_v38 = vld [vmem:[%s3735_s11 + $0x30] sm:$0xf]  ;;  %v3881_v39 = vld [vmem:[%s3735_s11 + $0x34] sm:$0xf] }
  0x38   : > { %1793 = vrot.lane.b32.xlu1 %v1622_v40, %s3642_s7  ;;  %v1114_v10 = vshll.u32 %v3095_v1, 16  ;;  %v1112_v20 = vshrl.u32 %v3095_v1, 16  ;;  %v3127_v30 = vcombine.low %v2967_v13, %v2922_v56  ;;  %v3144_v31 = vcombine.low %v2987_v21, %v3871_v22  ;;  %v3886_v45 = vld [vmem:[%s3735_s11 + $0x44] ss:$0 sps:$4 sm:$0x11]  }
  0x39   : > { %v1129_v33 = vor.u32 %v1128_v17, %v1124_v14  ;;  %v1133_v34 = vrot.slane %v1131_v15, 1  ;;  %v3143_v35 = vcombine.low %v2985_v26, %v2986_v27  ;;  %v1121_v37 = vrot.slane %v1119_v25, 1  ;;  %v3442_v49 = vld [vmem:[%s3735_s11 + $0x38] ss:$0 sps:$4 sm:$0x11]  }
  0x3a   : > { %1791 = vrot.lane.b32.xlu0 %v1610_v52, %s3642_s7  ;;  %v1116_v24 = vrot.slane %v1114_v10, 1  ;;  %v1368_v40 = vrot.slane %v3128_v28, 1  ;;  %v1369_v41 = vrot.slane %v3856_v3, 1  ;;  %v1365_v42 = vrot.slane %v3127_v30, 1  ;;  %v261_v52 = vld [vmem:[%s3735_s11 + $0x3c] sm:$0xf] }
  0x3b   : > { %v1366_v43 = vrot.slane %v3436_v11, 1  ;;  %v1638_v44 = vshll.u32 %v3144_v31, 16  ;;  %v1134_v46 = vsel %vm573_vm1, %v1129_v33, %v1133_v34  ;;  %v1626_v47 = vshll.u32 %v3143_v35, 16  ;;  %v262_v53 = vld [vmem:[%s3735_s11 + $0x40] sm:$0xf] }
  0x3c   : > { %770 = vrot.lane.b32.xlu1 %v609_v59, %s3639_s17  ;;  %v1117_v36 = vor.u32 %v1116_v24, %v1112_v20  ;;  %v3892_v50 = vcombine.low %v259_v38, %v3881_v39  ;;  %v1636_v54 = vshrl.u32 %v3144_v31, 16  ;;  %v1643_v56 = vshll.u32 %v3886_v45, 16  ;;  %v3031_v59 = vld [vmem:[%s3735_s11 + $0x30] sm:$0xe]  ;;  %v304_v24 = vld [vmem:[%s3735_s11 + $0x3c] sm:$0xe] }
  0x3d   : > { %v1640_v55 = vrot.slane %v1638_v44, 1  ;;  %v1370_v58 = vsel %vm846_vm0, %v1368_v40, %v1369_v41  ;;  %v3906_v61 = vcombine.low %v261_v52, %v262_v53  ;;  %v1624_v62 = vshrl.u32 %v3143_v35, 16  ;;  %v3446_v8 = vld [vmem:[%s3735_s11 + $0x44] ss:$0 sps:$4 sm:$0x11]  }
  0x3e   : > { %1919 = vrot.lane.b32.xlu0 %v1873_v57, %s3643_s8  ;;  %v1122_v51 = vsel %vm573_vm1, %v1117_v36, %v1121_v37  ;;  %v3900_v57 = vld [vmem:[%s3735_s11 + $0x38] ss:$0 sps:$4 sm:$0x11]   ;;  %v625_v60 = vshll.u32 %v3892_v50, 16  ;;  %v1628_v63 = vrot.slane %v1626_v47, 1  ;;  %v1631_v0 = vshll.u32 %v3442_v49, 16 }
  0x3f   : > { %v3175_v3 = vcombine.low %v3031_v59, %v2986_v27  ;;  %v1645_v5 = vrot.slane %v1643_v56, 1  ;;  %v630_v6 = vshll.u32 %v3900_v57, 16  ;;  %v623_v7 = vshrl.u32 %v3892_v50, 16  ;;  %v2928_v26 = vld [vmem:[%s3735_s11 + $0x4c] sm:$0xf] }
  0x40   : > { %772 = vrot.lane.b32.xlu1 %v621_v4, %s3639_s17  ;;  %v1641_v4 = vor.u32 %v1640_v55, %v1636_v54  ;;  %v637_v9 = vshll.u32 %v3906_v61, 16  ;;  %v1629_v10 = vor.u32 %v1628_v63, %v1624_v62  ;;  %v1633_v11 = vrot.slane %v1631_v0, 1  ;;  %v303_v27 = vld [vmem:[%s3735_s11 + $0x30] sm:$0xe]  ;;  %v2925_v28 = vld [vmem:[%s3735_s11 + $0x3c] sm:$0xf] }
  0x41   : > { %v632_v14 = vrot.slane %v630_v6, 1  ;;  %v1877_v15 = vrot.slane %v3175_v3, 1  ;;  %v635_v20 = vshrl.u32 %v3906_v61, 16  ;;  %v2926_v30 = vld [vmem:[%s3735_s11 + $0x40] sm:$0xf]  ;;  %v3082_v33 = vcombine.low %v304_v24, %v262_v53 }
  0x42   : > { %1921 = vrot.lane.b32.xlu0 %v1876_v2, %s3643_s8  ;;  %v627_v2 = vrot.slane %v625_v60, 1  ;;  %v1646_v13 = vsel %vm573_vm1, %v1641_v4, %v1645_v5  ;;  %v639_v21 = vrot.slane %v637_v9, 1  ;;  %v1634_v25 = vsel %vm573_vm1, %v1629_v10, %v1633_v11  ;;  %v3454_v53 = vld [vmem:[%s3735_s11 + $0x44] ss:$0 sps:$4 sm:$0x11]  }
  0x43   : > { %v1881_v40 = vrot.slane %v3886_v45, 1  ;;  %v3081_v41 = vcombine.low %v303_v27, %v3881_v39  ;;  %v862_v44 = vrot.slane %v3082_v33, 1  ;;  %v860_v52 = vrot.slane %v3900_v57, 1  ;;  %v2991_v54 = vld [vmem:[%s3735_s11 + $0x54] sm:$0xf] }
  0x44   : > { %901 = vrot.lane.b32.xlu1 %v858_v16, %s3638_s14  ;;  %v1878_v16 = vrot.slane %v3442_v49, 1  ;;  %v628_v17 = vor.u32 %v627_v2, %v623_v7  ;;  %v3453_v49 = vld [vmem:[%s3735_s11 + $0x50] ss:$0 sps:$4 sm:$0x11]   ;;  %v3944_v55 = vld [vmem:[%s3735_s11 + $0x58] sm:$0xf] }
  0x45   : > { %v859_v45 = vrot.slane %v3081_v41, 1  ;;  %v2969_v62 = vld [vmem:[%s3735_s11 + $0x3c] sm:$0xe]  ;;  %v3146_v3 = vcombine.low %v2991_v54, %v3944_v55  ;;  %v2989_v4 = vld [vmem:[%s3735_s11 + $0x48] sm:$0xf] }
  0x46   : > { %899 = vrot.lane.b32.xlu0 %v855_v19, %s3638_s14  ;;  %v642_v19 = vshll.u32 %v3446_v8, 16  ;;  %v633_v34 = vsel %vm573_vm1, %v628_v17, %v632_v14  ;;  %v1879_v38 = vsel %vm846_vm0, %v1877_v15, %v1878_v16  ;;  %v3954_v5 = vld [vmem:[%s3735_s11 + $0x4c] sm:$0xf]  ;;  %v3129_v7 = vcombine.low %v2969_v62, %v2926_v30  ;;  %v263_v9 = vld [vmem:[%s3735_s11 + $0x48] sm:$0xf] }
  0x47   : > { %v861_v57 = vsel %vm846_vm0, %v859_v45, %v860_v52  ;;  %v3960_v10 = vld [vmem:[%s3735_s11 + $0x4c] sm:$0xf]  ;;  %v1662_v14 = vshll.u32 %v3146_v3, 16  ;;  %v1375_v16 = vrot.slane %v3453_v49, 1  ;;  %v265_v27 = vld [vmem:[%s3735_s11 + $0x54] sm:$0xf] }
  0x48   : > { %1013 = vrot.lane.b32.xlu1 %v3096_v48, %s3636_s12  ;;  %v1367_v48 = vsel %vm846_vm0, %v1365_v42, %v1366_v43  ;;  %v644_v36 = vrot.slane %v642_v19, 1  ;;  %v3097_v42 = vcombine.low %v2925_v28, %v2926_v30  ;;  %v3965_v17 = vld [vmem:[%s3735_s11 + $0x5c] ss:$0 sps:$4 sm:$0x11]   ;;  %v1371_v19 = vrot.slane %v3129_v7, 1 }
  0x49   : > { %v3973_v24 = vld [vmem:[%s3735_s11 + $0x50] ss:$0 sps:$4 sm:$0x11]   ;;  %v3978_v28 = vld [vmem:[%s3735_s11 + $0x58] sm:$0xf]  ;;  %v1660_v30 = vshrl.u32 %v3146_v3, 16 }
  0x4a   : > { %1011 = vrot.lane.b32.xlu0 %v3095_v1, %s3636_s12  ;;  %v3032_v1 = vld [vmem:[%s3735_s11 + $0x3c] sm:$0xe]  ;;  %v1138_v39 = vshll.u32 %v3097_v42, 16  ;;  %v1136_v63 = vshrl.u32 %v3097_v42, 16  ;;  %v1667_v33 = vshll.u32 %v3965_v17, 16 }
  0x4b   : > { %v3176_v12 = vcombine.low %v3032_v1, %v3871_v22  ;;  %v2927_v22 = vld [vmem:[%s3735_s11 + $0x48] sm:$0xf]  ;;  %v1143_v1 = vshll.u32 %v3454_v53, 16  ;;  %v3464_v52 = vld [vmem:[%s3735_s11 + $0x5c] ss:$0 sps:$4 sm:$0x11]  }
  0x4c   : > { %1285 = vrot.lane.b32.xlu1 %v1134_v46, %s3640_s27  ;;  %v3098_v37 = vcombine.low %v2927_v22, %v2928_v26  ;;  %v863_v46 = vrot.slane %v3446_v8, 1  ;;  %v1140_v0 = vrot.slane %v1138_v39, 1  ;;  %v1372_v22 = vrot.slane %v3454_v53, 1  ;;  %v2931_v62 = vld [vmem:[%s3735_s11 + $0x60] sm:$0xf] }
  0x4d   : > { %v305_v7 = vld [vmem:[%s3735_s11 + $0x48] sm:$0xe] }
  0x4e   : > { %1283 = vrot.lane.b32.xlu0 %v1122_v51, %s3640_s27  ;;  %v1150_v47 = vshll.u32 %v3098_v37, 16  ;;  %v864_v56 = vsel %vm846_vm0, %v862_v44, %v863_v46  ;;  %v1148_v59 = vshrl.u32 %v3098_v37, 16  ;;  %v1141_v11 = vor.u32 %v1140_v0, %v1136_v63  ;;  %v3033_v44 = vld [vmem:[%s3735_s11 + $0x48] sm:$0xe] }
  0x4f   : > { %v3177_v53 = vcombine.low %v3033_v44, %v3954_v5 }
  0x50   : > { %1413 = vrot.lane.b32.xlu1 %v1370_v58, %s3637_s13  ;;  %v2970_v58 = vld [vmem:[%s3735_s11 + $0x48] sm:$0xe]  ;;  %v1152_v60 = vrot.slane %v1150_v47, 1  ;;  %v1669_v47 = vrot.slane %v1667_v33, 1 }
  0x51   : > { %v3130_v6 = vcombine.low %v2970_v58, %v2928_v26  ;;  %v3493_v58 = vld [vmem:[%s4974_s1 + $0x10] ss:$0 sps:$4 sm:$0x33]  }
  0x52   : > { %1411 = vrot.lane.b32.xlu0 %v1367_v48, %s3637_s13  ;;  %v1155_v48 = vshll.u32 %v3453_v49, 16  ;;  %v1153_v2 = vor.u32 %v1152_v60, %v1148_v59  ;;  %3342 = vmatprep.subr.msk.bf16.mxu0 %vm2275_vm2, %v3493_v58 }
  0x53   : > { %v1374_v15 = vrot.slane %v3130_v6, 1  ;;  %v1884_v6 = vrot.slane %v3973_v24, 1 }
  0x54   : > { %1525 = vrot.lane.b32.xlu1 %v3144_v31, %s3641_s29  ;;  %v1880_v31 = vrot.slane %v3176_v12, 1  ;;  %v1157_v8 = vrot.slane %v1155_v48, 1  ;;  %v1145_v12 = vrot.slane %v1143_v1, 1 }
  0x56   : > { %1523 = vrot.lane.b32.xlu0 %v3143_v35, %s3641_s29  ;;  %v640_v35 = vor.u32 %v639_v21, %v635_v20  ;;  %v1882_v51 = vsel %vm846_vm0, %v1880_v31, %v1881_v40  ;;  %v3968_v20 = vcombine.low %v263_v9, %v3960_v10  ;;  %v1158_v21 = vsel %vm573_vm1, %v1153_v2, %v1157_v8  ;;  %v2929_v2 = vld [vmem:[%s3735_s11 + $0x54] sm:$0xf]  ;;  %v2930_v8 = vld [vmem:[%s3735_s11 + $0x58] sm:$0xf] }
  0x57   : > { %v1664_v31 = vrot.slane %v1662_v14, 1  ;;  %v2277_v9 = vsel %vm2275_vm2, %v3493_v58, 0 }
  0x58   : > { %1797 = vrot.lane.b32.xlu1 %v1646_v13, %s3642_s7  ;;  %v645_v43 = vsel %vm573_vm1, %v640_v35, %v644_v36  ;;  %v3145_v13 = vcombine.low %v2989_v4, %v3954_v5  ;;  %v649_v35 = vshll.u32 %v3968_v20, 16  ;;  %v1376_v36 = vsel %vm846_vm0, %v1374_v15, %v1375_v16  ;;  %v4013_v5 = vld [vmem:[%s3735_s11 + $0x64] sm:$0xf]  ;;  %3273 = vmatpush3.bf16.msra.mxu0 %v2277_v9  ;;  %v269_v9 = vld [vmem:[%s3735_s11 + $0x6c] sm:$0xf] }
  0x59   : > { %v1665_v46 = vor.u32 %v1664_v31, %v1660_v30  ;;  %v647_v49 = vshrl.u32 %v3968_v20, 16  ;;  %v666_v4 = vshll.u32 %v3464_v52, 16  ;;  %v3471_v30 = vld [vmem:[%s3735_s11 + $0x68] ss:$0 sps:$4 sm:$0x11]  }
  0x5a   : > { %1795 = vrot.lane.b32.xlu0 %v1634_v25, %s3642_s7  ;;  %v1146_v25 = vsel %vm573_vm1, %v1141_v11, %v1145_v12  ;;  %v1650_v26 = vshll.u32 %v3145_v13, 16  ;;  %v1648_v40 = vshrl.u32 %v3145_v13, 16  ;;  %v3100_v12 = vcombine.low %v2931_v62, %v4013_v5  ;;  %v3472_v31 = vld [vmem:[%s3735_s11 + $0x5c] ss:$0 sps:$4 sm:$0x11]  }
  0x5b   : > { %v1670_v60 = vsel %vm573_vm1, %v1665_v46, %v1669_v47  ;;  %v668_v15 = vrot.slane %v666_v4, 1  ;;  %v1179_v44 = vshll.u32 %v3471_v30, 16  ;;  %v1167_v46 = vshll.u32 %v3472_v31, 16  ;;  %v4053_v62 = vld [vmem:[%s3735_s11 + $0x64] sm:$0xf] }
  0x5c   : > { %774 = vrot.lane.b32.xlu1 %v633_v34, %s3639_s17  ;;  %v3983_v34 = vld [vmem:[%s3735_s11 + $0x50] ss:$0 sps:$4 sm:$0x11]   ;;  %v1652_v41 = vrot.slane %v1650_v26, 1  ;;  %v869_v26 = vrot.slane %v3464_v52, 1 }
  0x5d   : > { %v654_v45 = vshll.u32 %v3983_v34, 16  ;;  %v2993_v52 = vld [vmem:[%s3735_s11 + $0x60] sm:$0xf]  ;;  %v1181_v58 = vrot.slane %v1179_v44, 1  ;;  %v3036_v44 = vld [vmem:[%s3735_s11 + $0x6c] sm:$0xe] }
  0x5e   : > { %1923 = vrot.lane.b32.xlu0 %v1879_v38, %s3643_s8  ;;  %v1373_v38 = vsel %vm846_vm0, %v1371_v19, %v1372_v22  ;;  %v1653_v54 = vor.u32 %v1652_v41, %v1648_v40  ;;  %v1887_v19 = vrot.slane %v3965_v17, 1  ;;  %v4039_v40 = vld [vmem:[%s3735_s11 + $0x70] sm:$0xf]  ;;  %v2972_v41 = vld [vmem:[%s3735_s11 + $0x60] sm:$0xe] }
  0x5f   : > { %v656_v48 = vrot.slane %v654_v45, 1 }
  0x60   : > { %776 = vrot.lane.b32.xlu1 %v645_v43, %s3639_s17  ;;  %v3034_v43 = vld [vmem:[%s3735_s11 + $0x54] sm:$0xe] }
  0x61   : > { %v3178_v59 = vcombine.low %v3034_v43, %v3944_v55 }
  0x62   : > { %1925 = vrot.lane.b32.xlu0 %v1882_v51, %s3643_s8  ;;  %v651_v51 = vrot.slane %v649_v35, 1 }
  0x63   : > { %v1886_v16 = vrot.slane %v3178_v59, 1  ;;  %v1169_v59 = vrot.slane %v1167_v46, 1 }
  0x64   : > { %905 = vrot.lane.b32.xlu1 %v864_v56, %s3638_s14  ;;  %v652_v63 = vor.u32 %v651_v51, %v647_v49 }
  0x65   : > { %v1888_v17 = vsel %vm846_vm0, %v1886_v16, %v1887_v19 }
  0x66   : > { %903 = vrot.lane.b32.xlu0 %v861_v57, %s3638_s14  ;;  %v306_v57 = vld [vmem:[%s3735_s11 + $0x54] sm:$0xe] }
  0x67   : > { %v3084_v11 = vcombine.low %v306_v57, %v3978_v28  ;;  %v267_v57 = vld [vmem:[%s3735_s11 + $0x60] sm:$0xf] }
  0x68   : > { %1017 = vrot.lane.b32.xlu1 %v3098_v37, %s3636_s12  ;;  %v3989_v37 = vcombine.low %v265_v27, %v3978_v28  ;;  %v1174_v27 = vshll.u32 %v3100_v12, 16 }
  0x69   : > { %v868_v22 = vrot.slane %v3084_v11, 1  ;;  %v4068_v11 = vld [vmem:[%s3735_s11 + $0x70] sm:$0xf] }
  0x6a   : > { %1015 = vrot.lane.b32.xlu0 %v3097_v42, %s3636_s12  ;;  %v1655_v42 = vshll.u32 %v3973_v24, 16  ;;  %v661_v39 = vshll.u32 %v3989_v37, 16  ;;  %v659_v0 = vshrl.u32 %v3989_v37, 16  ;;  %v3083_v24 = vcombine.low %v305_v7, %v3960_v10 }
  0x6b   : > { %v866_v10 = vrot.slane %v3983_v34, 1  ;;  %v1176_v43 = vrot.slane %v1174_v27, 1  ;;  %v2971_v34 = vld [vmem:[%s3735_s11 + $0x54] sm:$0xe] }
  0x6c   : > { %1289 = vrot.lane.b32.xlu1 %v1158_v21, %s3640_s27  ;;  %v1657_v56 = vrot.slane %v1655_v42, 1  ;;  %v663_v1 = vrot.slane %v661_v39, 1  ;;  %v865_v33 = vrot.slane %v3083_v24, 1  ;;  %v1172_v42 = vshrl.u32 %v3100_v12, 16  ;;  %v2994_v39 = vld [vmem:[%s3735_s11 + $0x64] sm:$0xf] }
  0x6d   : > { %v4080_v24 = vcombine.low %v269_v9, %v4068_v11 }
  0x6e   : > { %1287 = vrot.lane.b32.xlu0 %v1146_v25, %s3640_s27  ;;  %v1658_v55 = vsel %vm573_vm1, %v1653_v54, %v1657_v56  ;;  %v664_v14 = vor.u32 %v663_v1, %v659_v0  ;;  %v3099_v25 = vcombine.low %v2929_v2, %v2930_v8  ;;  %v867_v47 = vsel %vm846_vm0, %v865_v33, %v866_v10  ;;  %v4057_v1 = vld [vmem:[%s3735_s11 + $0x74] ss:$0 sps:$4 sm:$0x11]  }
  0x6f   : > { %v3131_v54 = vcombine.low %v2971_v34, %v2930_v8  ;;  %v1177_v56 = vor.u32 %v1176_v43, %v1172_v42  ;;  %v1378_v2 = vrot.slane %v3472_v31, 1  ;;  %v1893_v9 = vrot.slane %v4057_v1, 1 }
  0x70   : > { %1417 = vrot.lane.b32.xlu1 %v1376_v36, %s3637_s13  ;;  %v669_v28 = vsel %vm573_vm1, %v664_v14, %v668_v15  ;;  %v1162_v35 = vshll.u32 %v3099_v25, 16  ;;  %v870_v36 = vsel %vm846_vm0, %v868_v22, %v869_v26  ;;  %v1160_v49 = vshrl.u32 %v3099_v25, 16  ;;  %v4073_v15 = vld [vmem:[%s3735_s11 + $0x68] ss:$0 sps:$4 sm:$0x11]  }
  0x71   : > { %v1182_v4 = vsel %vm573_vm1, %v1177_v56, %v1181_v58  ;;  %v1691_v14 = vshll.u32 %v4057_v1, 16  ;;  %v678_v10 = vshll.u32 %v4073_v15, 16  ;;  %v3180_v58 = vcombine.low %v3036_v44, %v4039_v40 }
  0x72   : > { %1415 = vrot.lane.b32.xlu0 %v1373_v38, %s3637_s13  ;;  %v2995_v38 = vld [vmem:[%s3735_s11 + $0x6c] sm:$0xf]  ;;  %v1164_v51 = vrot.slane %v1162_v35, 1 }
  0x73   : > { %v3148_v45 = vcombine.low %v2995_v38, %v4039_v40  ;;  %v1693_v33 = vrot.slane %v1691_v14, 1  ;;  %v3482_v38 = vld [vmem:[%s3735_s11 + $0x74] ss:$0 sps:$4 sm:$0x11]  }
  0x74   : > { %1529 = vrot.lane.b32.xlu1 %v3146_v3, %s3641_s29  ;;  %v1883_v3 = vrot.slane %v3177_v53, 1  ;;  %v3132_v53 = vcombine.low %v2972_v41, %v4013_v5  ;;  %v1381_v5 = vrot.slane %v3471_v30, 1  ;;  %v685_v41 = vshll.u32 %v4080_v24, 16 }
  0x75   : > { %v690_v56 = vshll.u32 %v3482_v38, 16  ;;  %v875_v14 = vrot.slane %v3482_v38, 1 }
  0x76   : > { %1527 = vrot.lane.b32.xlu0 %v3145_v13, %s3641_s29  ;;  %v657_v13 = vsel %vm573_vm1, %v652_v63, %v656_v48  ;;  %v1885_v21 = vsel %vm846_vm0, %v1883_v3, %v1884_v6  ;;  %v3147_v48 = vcombine.low %v2993_v52, %v2994_v39  ;;  %v1686_v63 = vshll.u32 %v3148_v45, 16  ;;  %v3478_v3 = vld [vmem:[%s3735_s11 + $0x68] ss:$0 sps:$4 sm:$0x11]  }
  0x77   : > { %v1380_v0 = vrot.slane %v3132_v53, 1  ;;  %v4063_v6 = vcombine.low %v267_v57, %v4053_v62  ;;  %v1679_v27 = vshll.u32 %v3478_v3, 16  ;;  %v683_v53 = vshrl.u32 %v4080_v24, 16  ;;  %v2935_v57 = vld [vmem:[%s3735_s11 + $0x78] sm:$0xf] }
  0x78   : > { %1801 = vrot.lane.b32.xlu1 %v1670_v60, %s3642_s7  ;;  %v1165_v60 = vor.u32 %v1164_v51, %v1160_v49  ;;  %v1674_v8 = vshll.u32 %v3147_v48, 16  ;;  %v1672_v22 = vshrl.u32 %v3147_v48, 16  ;;  %v1890_v49 = vrot.slane %v3478_v3, 1  ;;  %v308_v51 = vld [vmem:[%s3735_s11 + $0x6c] sm:$0xe] }
  0x79   : > { %v1382_v16 = vsel %vm846_vm0, %v1380_v0, %v1381_v5  ;;  %v673_v19 = vshll.u32 %v4063_v6, 16  ;;  %v671_v35 = vshrl.u32 %v4063_v6, 16  ;;  %v1681_v43 = vrot.slane %v1679_v27, 1  ;;  %v2933_v0 = vld [vmem:[%s3735_s11 + $0x6c] sm:$0xf] }
  0x7a   : > { %1799 = vrot.lane.b32.xlu0 %v1658_v55, %s3642_s7  ;;  %v1377_v55 = vrot.slane %v3131_v54, 1  ;;  %v1170_v7 = vsel %vm573_vm1, %v1165_v60, %v1169_v59  ;;  %v1676_v26 = vrot.slane %v1674_v8, 1  ;;  %v687_v54 = vrot.slane %v685_v41, 1 }
  0x7b   : > { %v3086_v5 = vcombine.low %v308_v51, %v4068_v11  ;;  %v692_v3 = vrot.slane %v690_v56, 1  ;;  %v1892_v8 = vrot.slane %v3180_v58, 1  ;;  %v4162_v51 = vld [vmem:[%s3735_s11 + $0x7c] sm:$0xf] }
  0x7c   : > { %778 = vrot.lane.b32.xlu1 %v657_v13, %s3639_s17  ;;  %v1688_v13 = vrot.slane %v1686_v63, 1  ;;  %v1677_v42 = vor.u32 %v1676_v26, %v1672_v22  ;;  %v4108_v63 = vld [vmem:[%s3735_s11 + $0x7c] sm:$0xf]  ;;  %v872_v26 = vrot.slane %v4073_v15, 1 }
  0x7e   : > { %1927 = vrot.lane.b32.xlu0 %v1885_v21, %s3643_s8  ;;  %v3035_v21 = vld [vmem:[%s3735_s11 + $0x60] sm:$0xe]  ;;  %v1682_v60 = vsel %vm573_vm1, %v1677_v42, %v1681_v43  ;;  %v2999_v42 = vld [vmem:[%s3735_s11 + $0x84] sm:$0xf]  ;;  %v4154_v43 = vld [vmem:[%s3735_s11 + $0x88] sm:$0xf] }
  0x7f   : > { %v3179_v31 = vcombine.low %v3035_v21, %v2994_v39 }
  0x80   : > { %780 = vrot.lane.b32.xlu1 %v669_v28, %s3639_s17 }
  0x81   : > { %v1889_v34 = vrot.slane %v3179_v31, 1  ;;  %v4142_v31 = vld [vmem:[%s3735_s11 + $0x74] ss:$0 sps:$4 sm:$0x11]  }
  0x82   : > { %1929 = vrot.lane.b32.xlu0 %v1888_v17, %s3643_s8 }
  0x84   : > { %909 = vrot.lane.b32.xlu1 %v870_v36, %s3638_s14  ;;  %v675_v36 = vrot.slane %v673_v19, 1  ;;  %v874_v19 = vrot.slane %v3086_v5, 1  ;;  %v271_v5 = vld [vmem:[%s3735_s11 + $0x78] sm:$0xf] }
  0x86   : > { %907 = vrot.lane.b32.xlu0 %v867_v47, %s3638_s14  ;;  %v680_v47 = vrot.slane %v678_v10, 1  ;;  %v676_v39 = vor.u32 %v675_v36, %v671_v35  ;;  %v2973_v10 = vld [vmem:[%s3735_s11 + $0x6c] sm:$0xe]  ;;  %v876_v15 = vsel %vm846_vm0, %v874_v19, %v875_v14 }
  0x88   : > { %1021 = vrot.lane.b32.xlu1 %v3100_v12, %s3636_s12  ;;  %v1684_v12 = vshrl.u32 %v3148_v45, 16  ;;  %v681_v40 = vsel %vm573_vm1, %v676_v39, %v680_v47 }
  0x8a   : > { %1019 = vrot.lane.b32.xlu0 %v3099_v25, %s3636_s12  ;;  %v1379_v25 = vsel %vm846_vm0, %v1377_v55, %v1378_v2  ;;  %v1689_v17 = vor.u32 %v1688_v13, %v1684_v12  ;;  %v688_v55 = vor.u32 %v687_v54, %v683_v53 }
  0x8c   : > { %1293 = vrot.lane.b32.xlu1 %v1182_v4, %s3640_s27  ;;  %v1694_v46 = vsel %vm573_vm1, %v1689_v17, %v1693_v33  ;;  %v4112_v4 = vld [vmem:[%s3735_s11 + $0x70] sm:$0xf]  ;;  %v693_v21 = vsel %vm573_vm1, %v688_v55, %v692_v3  ;;  %v2974_v33 = vld [vmem:[%s3735_s11 + $0x78] sm:$0xe] }
  0x8d   : > { %v4127_v13 = vcombine.low %v2933_v0, %v4112_v4  ;;  %v3134_v54 = vcombine.low %v2974_v33, %v4108_v63  ;;  %v3133_v56 = vcombine.low %v2973_v10, %v4112_v4 }
  0x8e   : > { %1291 = vrot.lane.b32.xlu0 %v1170_v7, %s3640_s27  ;;  %v4120_v7 = vcombine.low %v2935_v57, %v4108_v63 }
  0x8f   : > { %v1186_v27 = vshll.u32 %v4127_v13, 16  ;;  %v1184_v41 = vshrl.u32 %v4127_v13, 16  ;;  %v1386_v55 = vrot.slane %v3134_v54, 1  ;;  %v3038_v54 = vld [vmem:[%s3735_s11 + $0x84] sm:$0xe] }
  0x90   : > { %1421 = vrot.lane.b32.xlu1 %v1382_v16, %s3637_s13  ;;  %v4084_v28 = vpop.permute.xlu1 %1009  ;;  %v4131_v16 = vld [vmem:[%s3735_s11 + $0x80] ss:$0 sps:$4 sm:$0x11]   ;;  %v1198_v1 = vshll.u32 %v4120_v7, 16  ;;  %v1196_v35 = vshrl.u32 %v4120_v7, 16 }
  0x91   : > { %v4086_v30 = vpop.permute.xlu0 %1007  ;;  %v1203_v36 = vshll.u32 %v4131_v16, 16  ;;  %v1188_v47 = vrot.slane %v1186_v27, 1  ;;  %v1387_v3 = vrot.slane %v4131_v16, 1 }
  0x92   : > { %1419 = vrot.lane.b32.xlu0 %v1379_v25, %s3637_s13  ;;  %v1200_v38 = vrot.slane %v1198_v1, 1 }
  0x93   : > { %v1189_v4 = vor.u32 %v1188_v47, %v1184_v41  ;;  %v1388_v27 = vsel %vm846_vm0, %v1386_v55, %v1387_v3 }
  0x94   : > { %1533 = vrot.lane.b32.xlu1 %v3148_v45, %s3641_s29  ;;  %v307_v45 = vld [vmem:[%s3735_s11 + $0x60] sm:$0xe] }
  0x95   : > { %v4098_v52 = vpop.permute.xlu0 %1407  ;;  %v3085_v12 = vcombine.low %v307_v45, %v4053_v62  ;;  %v1894_v62 = vsel %vm846_vm0, %v1892_v8, %v1893_v9  ;;  %v4170_v45 = vcombine.low %v2999_v42, %v4154_v43  ;;  %v1383_v8 = vrot.slane %v3133_v56, 1 }
  0x96   : > { %1531 = vrot.lane.b32.xlu0 %v3147_v48, %s3641_s29  ;;  %v4103_v59 = vpop.permute.xlu1 %895  ;;  %v1891_v48 = vsel %vm846_vm0, %v1889_v34, %v1890_v49  ;;  %v1191_v34 = vshll.u32 %v4142_v31, 16  ;;  %v2997_v49 = vld [vmem:[%s3735_s11 + $0x78] sm:$0xf]  ;;  %v1384_v9 = vrot.slane %v4142_v31, 1 }
  0x97   : > { %v871_v22 = vrot.slane %v3085_v12, 1  ;;  %v4176_v57 = vcombine.low %v2997_v49, %v4162_v51  ;;  %v1710_v12 = vshll.u32 %v4170_v45, 16 }
  0x98   : > { %1805 = vrot.lane.b32.xlu1 %v1694_v46, %s3642_s7  ;;  %v1385_v31 = vsel %vm846_vm0, %v1383_v8, %v1384_v9 }
  0x99   : > { %v873_v46 = vsel %vm846_vm0, %v871_v22, %v872_v26  ;;  %v273_v22 = vld [vmem:[%s3735_s11 + $0x84] sm:$0xf]  ;;  %v1712_v33 = vrot.slane %v1710_v12, 1  ;;  %v3182_v12 = vcombine.low %v3038_v54, %v4154_v43  ;;  %v3510_v54 = vld [vmem:[%s3735_s11 + $0x98] ss:$0 sps:$4 sm:$0x11]  }
  0x9a   : > { %1803 = vrot.lane.b32.xlu0 %v1682_v60, %s3642_s7  ;;  %v4122_v2 = vpop.permute.xlu1 %897  ;;  %v1205_v60 = vrot.slane %v1203_v36, 1  ;;  %v1696_v36 = vshrl.u32 %v4176_v57, 16 }
  0x9c   : > { %v767_v11 = vpop.permute.xlu0 %766  ;;  %782 = vrot.lane.b32.xlu1 %v681_v40, %s3639_s17  ;;  %v4184_v40 = vld [vmem:[%s3735_s11 + $0x7c] sm:$0xf] }
  0x9d   : > { %v1953_v39 = vsel %vm1951_vm3, %v3763_v23, %v767_v11  ;;  %v1201_v23 = vor.u32 %v1200_v38, %v1196_v35  ;;  %v4194_v11 = vld [vmem:[%s3735_s11 + $0x8c] ss:$0 sps:$4 sm:$0x11]   ;;  %v4222_v35 = vld [vmem:[%s3735_s11 + $0x80] ss:$0 sps:$4 sm:$0x11]  }
  0x9e   : > { %1931 = vrot.lane.b32.xlu0 %v1891_v48, %s3643_s8  ;;  %v4136_v25 = vpop.permute.xlu1 %1409  ;;  %v1986_v63 = vsel %vm1984_vm4, %v1953_v39, %v4103_v59  ;;  %v1193_v48 = vrot.slane %v1191_v34, 1  ;;  %v1715_v10 = vshll.u32 %v4194_v11, 16  ;;  %v3037_v39 = vld [vmem:[%s3735_s11 + $0x78] sm:$0xe] }
  0x9f   : > { %v2019_v14 = vsel %vm2017_vm5, %v1986_v63, %v4086_v30  ;;  %v1206_v16 = vsel %vm573_vm1, %v1201_v23, %v1205_v60  ;;  %v4212_v30 = vld [vmem:[%s3735_s11 + $0x88] sm:$0xf]  ;;  %v3181_v55 = vcombine.low %v3037_v39, %v4162_v51 }
  0xa0   : > { %v769_v17 = vpop.permute.xlu0 %768  ;;  %784 = vrot.lane.b32.xlu1 %v693_v21, %s3639_s17  ;;  %v4203_v21 = vld [vmem:[%s3735_s11 + $0x80] ss:$0 sps:$4 sm:$0x11]   ;;  %v4230_v38 = vcombine.low %v273_v22, %v4212_v30 }
  0xa1   : > { %v1955_v58 = vsel %vm1951_vm3, %v3768_v29, %v769_v17  ;;  %v1708_v17 = vshrl.u32 %v4170_v45, 16  ;;  %v1896_v22 = vrot.slane %v4203_v21, 1 }
  0xa2   : > { %1933 = vrot.lane.b32.xlu0 %v1894_v62, %s3643_s8  ;;  %v4156_v44 = vpop.permute.xlu1 %1281  ;;  %v1988_v59 = vsel %vm1984_vm4, %v1955_v58, %v4122_v2  ;;  %v1698_v2 = vshll.u32 %v4176_v57, 16  ;;  %v1194_v62 = vsel %vm573_vm1, %v1189_v4, %v1193_v48  ;;  %v1717_v58 = vrot.slane %v1715_v10, 1  ;;  %v4250_v4 = vld [vmem:[%s3735_s11 + $0x8c] ss:$0 sps:$4 sm:$0x11]  }
  0xa3   : > { %v1713_v56 = vor.u32 %v1712_v33, %v1708_v17  ;;  %v709_v48 = vshll.u32 %v4230_v38, 16  ;;  %v714_v43 = vshll.u32 %v4250_v4, 16  ;;  %v4283_v17 = vld [vmem:[%s3735_s11 + $0x88] sm:$0xf]  ;;  %v1898_v33 = vrot.slane %v3182_v12, 1 }
  0xa4   : > { %v1280_v53 = vpop.permute.xlu0 %1279  ;;  %913 = vrot.lane.b32.xlu1 %v876_v15, %s3638_s14  ;;  %v1700_v47 = vrot.slane %v1698_v2, 1 }
  0xa5   : > { %v2052_v19 = vsel %vm2050_vm6, %v2019_v14, %v1280_v53  ;;  %v711_v2 = vrot.slane %v709_v48, 1  ;;  %v2976_v48 = vld [vmem:[%s3735_s11 + $0x90] sm:$0xe] }
  0xa6   : > { %911 = vrot.lane.b32.xlu0 %v873_v46, %s3638_s14  ;;  %v4180_v0 = vpop.permute.xlu1 %1521 }
  0xa8   : > { %v1520_v29 = vpop.permute.xlu0 %1519  ;;  %1025 = vrot.lane.b32.xlu1 %v4120_v7, %s3636_s12  ;;  %v4206_v7 = vcombine.low %v271_v5, %v4184_v40 }
  0xaa   : > { %1023 = vrot.lane.b32.xlu0 %v4127_v13, %s3636_s12  ;;  %v1794_v1 = vpop.permute.xlu1 %1793  ;;  %v2021_v13 = vsel %vm2017_vm5, %v1988_v59, %v4084_v28  ;;  %v2085_v28 = vsel %vm2083_vm7, %v2052_v19, %v4098_v52  ;;  %v697_v15 = vshll.u32 %v4206_v7, 16  ;;  %v1703_v52 = vshll.u32 %v4203_v21, 16  ;;  %v310_v19 = vld [vmem:[%s3735_s11 + $0x84] sm:$0xe] }
  0xab   : > { %v2054_v41 = vsel %vm2050_vm6, %v2021_v13, %v4156_v44  ;;  %v2118_v42 = vsel %vm2116_vm8, %v2085_v28, %v1520_v29  ;;  %v702_v44 = vshll.u32 %v4222_v35, 16  ;;  %v695_v60 = vshrl.u32 %v4206_v7, 16  ;;  %v2939_v13 = vld [vmem:[%s3735_s11 + $0x90] sm:$0xf] }
  0xac   : > { %v1792_v26 = vpop.permute.xlu0 %1791  ;;  %1297 = vrot.lane.b32.xlu1 %v1206_v16, %s3640_s27  ;;  %v2087_v23 = vsel %vm2083_vm7, %v2054_v41, %v4136_v25  ;;  %v699_v63 = vrot.slane %v697_v15, 1  ;;  %v1701_v25 = vor.u32 %v1700_v47, %v1696_v36  ;;  %v1705_v3 = vrot.slane %v1703_v52, 1 }
  0xad   : > { %v2151_v34 = vsel %vm2149_vm9, %v2118_v42, %v1792_v26  ;;  %v2120_v5 = vsel %vm2116_vm8, %v2087_v23, %v4180_v0  ;;  %v1718_v0 = vsel %vm573_vm1, %v1713_v56, %v1717_v58  ;;  %v704_v14 = vrot.slane %v702_v44, 1  ;;  %v4276_v26 = vld [vmem:[%s3735_s11 + $0x94] sm:$0xf] }
  0xae   : > { %1295 = vrot.lane.b32.xlu0 %v1194_v62, %s3640_s27  ;;  %v4235_v46 = vpop.permute.xlu1 %770  ;;  %v2153_v59 = vsel %vm2149_vm9, %v2120_v5, %v1794_v1  ;;  %v700_v51 = vor.u32 %v699_v63, %v695_v60  ;;  %v707_v16 = vshrl.u32 %v4230_v38, 16  ;;  %v1895_v62 = vrot.slane %v3181_v55, 1  ;;  %v3511_v60 = vld [vmem:[%s3735_s11 + $0x8c] ss:$0 sps:$4 sm:$0x11]  }
  0xaf   : > { %v3088_v10 = vcombine.low %v310_v19, %v4212_v30  ;;  %v716_v36 = vrot.slane %v714_v43, 1  ;;  %v3104_v15 = vcombine.low %v2939_v13, %v4276_v26  ;;  %v1899_v47 = vrot.slane %v4194_v11, 1  ;;  %v3003_v5 = vld [vmem:[%s3735_s11 + $0x9c] sm:$0xf]  ;;  %v4312_v55 = vld [vmem:[%s3735_s11 + $0xa0] sm:$0xf] }
  0xb0   : > { %v1920_v49 = vpop.permute.xlu0 %1919  ;;  %1425 = vrot.lane.b32.xlu1 %v1388_v27, %s3637_s13  ;;  %v309_v27 = vld [vmem:[%s3735_s11 + $0x78] sm:$0xe]  ;;  %v705_v28 = vsel %vm573_vm1, %v700_v51, %v704_v14  ;;  %v712_v21 = vor.u32 %v711_v2, %v707_v16  ;;  %v1897_v42 = vsel %vm846_vm0, %v1895_v62, %v1896_v22  ;;  %v878_v44 = vrot.slane %v4222_v35, 1  ;;  %v3001_v43 = vld [vmem:[%s3735_s11 + $0x90] sm:$0xf] }
  0xb1   : > { %v2184_v53 = vsel %vm2182_vm10, %v2151_v34, %v1920_v49  ;;  %v3087_v52 = vcombine.low %v309_v27, %v4184_v40  ;;  %v880_v39 = vrot.slane %v3088_v10, 1  ;;  %v1222_v11 = vshll.u32 %v3104_v15, 16  ;;  %v4326_v19 = vld [vmem:[%s3735_s11 + $0x94] sm:$0xf] }
  0xb2   : > { %1423 = vrot.lane.b32.xlu0 %v1385_v31, %s3637_s13  ;;  %3274 = vmatprep.mubr.msk.bf16.mxu0 %vm2242_vm11, %v2184_v53  ;;  %v4255_v29 = vpop.permute.xlu1 %772  ;;  %v2937_v31 = vld [vmem:[%s3735_s11 + $0x84] sm:$0xf]  ;;  %v717_v49 = vsel %vm573_vm1, %v712_v21, %v716_v36  ;;  %v881_v53 = vrot.slane %v4250_v4, 1  ;;  %v1900_v56 = vsel %vm846_vm0, %v1898_v33, %v1899_v47  ;;  %v1215_v14 = vshll.u32 %v3511_v60, 16  ;;  %v275_v33 = vld [vmem:[%s3735_s11 + $0x90] sm:$0xf] }
  0xb3   : > { %v3103_v30 = vcombine.low %v2937_v31, %v4283_v17  ;;  %v877_v58 = vrot.slane %v3087_v52, 1  ;;  %v3136_v16 = vcombine.low %v2976_v48, %v4276_v26  ;;  %v4322_v2 = vcombine.low %v3003_v5, %v4312_v55  ;;  %v4338_v10 = vld [vmem:[%s3735_s11 + $0x94] sm:$0xf]  ;;  %v4343_v52 = vld [vmem:[%s3735_s11 + $0xa4] ss:$0 sps:$4 sm:$0x11]  }
  0xb4   : > { %v1922_v8 = vpop.permute.xlu0 %1921  ;;  %1537 = vrot.lane.b32.xlu1 %v4170_v45, %s3641_s29  ;;  %v1706_v45 = vsel %vm573_vm1, %v1701_v25, %v1705_v3  ;;  %v882_v4 = vsel %vm846_vm0, %v880_v39, %v881_v53  ;;  %v2975_v25 = vld [vmem:[%s3735_s11 + $0x84] sm:$0xe]  ;;  %v1220_v3 = vshrl.u32 %v3104_v15, 16  ;;  %v1217_v26 = vrot.slane %v1215_v14, 1 }
  0xb5   : > { %v2186_v9 = vsel %vm2182_vm10, %v2153_v59, %v1922_v8  ;;  %v1210_v23 = vshll.u32 %v3103_v30, 16  ;;  %v1224_v59 = vrot.slane %v1222_v11, 1  ;;  %v1227_v8 = vshll.u32 %v3510_v54, 16  ;;  %v4351_v53 = vld [vmem:[%s3735_s11 + $0x98] ss:$0 sps:$4 sm:$0x11]  }
  0xb6   : > { %1535 = vrot.lane.b32.xlu0 %v4176_v57, %s3641_s29  ;;  %3275 = vmatmul.mubr.msk.bf16.vlgmr.msra.gmra.mrb[0].mxu0 %vm2242_vm11, %v2186_v9  ;;  %v4270_v1 = vpop.permute.xlu1 %901  ;;  %v879_v9 = vsel %vm846_vm0, %v877_v58, %v878_v44  ;;  %v1208_v12 = vshrl.u32 %v3103_v30, 16  ;;  %v4334_v31 = vcombine.low %v3001_v43, %v4326_v19  ;;  %v1392_v21 = vrot.slane %v3136_v16, 1  ;;  %v277_v44 = vld [vmem:[%s3735_s11 + $0x9c] sm:$0xf]  ;;  %v3039_v43 = vld [vmem:[%s3735_s11 + $0x90] sm:$0xe] }
  0xb7   : > { %v1225_v62 = vor.u32 %v1224_v59, %v1220_v3  ;;  %v1229_v22 = vrot.slane %v1227_v8, 1  ;;  %v1734_v36 = vshll.u32 %v4322_v2, 16  ;;  %v1390_v47 = vrot.slane %v3511_v60, 1  ;;  %v4374_v3 = vld [vmem:[%s3735_s11 + $0x98] ss:$0 sps:$4 sm:$0x11]  }
  0xb8   : > { %v4278_v57 = vpop.permute.xlu0 %899  ;;  %1809 = vrot.lane.b32.xlu1 %v1718_v0, %s3642_s7  ;;  %v1212_v0 = vrot.slane %v1210_v23, 1  ;;  %v4354_v11 = vcombine.low %v275_v33, %v4338_v10  ;;  %v1722_v58 = vshll.u32 %v4334_v31, 16  ;;  %v1732_v60 = vshrl.u32 %v4322_v2, 16 }
  0xb9   : > { %v1230_v39 = vsel %vm573_vm1, %v1225_v62, %v1229_v22  ;;  %v1736_v48 = vrot.slane %v1734_v36, 1  ;;  %v1727_v16 = vshll.u32 %v4351_v53, 16  ;;  %v3183_v36 = vcombine.low %v3039_v43, %v4326_v19 }
  0xba   : > { %1807 = vrot.lane.b32.xlu0 %v1706_v45, %s3642_s7  ;;  %v4290_v41 = vpop.permute.xlu1 %1013  ;;  %v3135_v45 = vcombine.low %v2975_v25, %v4283_v17  ;;  %v1213_v27 = vor.u32 %v1212_v0, %v1208_v12  ;;  %v1393_v17 = vrot.slane %v3510_v54, 1  ;;  %v1720_v25 = vshrl.u32 %v4334_v31, 16 }
  0xbb   : > { %v1724_v14 = vrot.slane %v1722_v58, 1  ;;  %v312_v58 = vld [vmem:[%s3735_s11 + $0x9c] sm:$0xe]  ;;  %v884_v43 = vrot.slane %v4374_v3, 1 }
  0xbc   : > { %v4296_v34 = vpop.permute.xlu0 %1011  ;;  %786 = vrot.lane.b32.xlu1 %v705_v28, %s3639_s17  ;;  %v1394_v23 = vsel %vm846_vm0, %v1392_v21, %v1393_v17 }
  0xbe   : > { %1935 = vrot.lane.b32.xlu0 %v1897_v42, %s3643_s8  ;;  %v4303_v40 = vpop.permute.xlu1 %1285  ;;  %v1389_v42 = vrot.slane %v3135_v45, 1  ;;  %v1737_v45 = vor.u32 %v1736_v48, %v1732_v60  ;;  %v1901_v48 = vrot.slane %v3183_v36, 1 }
  0xc0   : > { %v1284_v63 = vpop.permute.xlu0 %1283  ;;  %788 = vrot.lane.b32.xlu1 %v717_v49, %s3639_s17  ;;  %v1957_v49 = vsel %vm1951_vm3, %v3816_v18, %v4235_v46  ;;  %v4362_v18 = vld [vmem:[%s3735_s11 + $0xa0] sm:$0xf]  ;;  %v1391_v5 = vsel %vm846_vm0, %v1389_v42, %v1390_v47  ;;  %v1729_v42 = vrot.slane %v1727_v16, 1 }
  0xc1   : > { %v4383_v8 = vcombine.low %v277_v44, %v4362_v18 }
  0xc2   : > { %1937 = vrot.lane.b32.xlu0 %v1900_v56, %s3643_s8  ;;  %v4317_v35 = vpop.permute.xlu1 %1413  ;;  %v1218_v56 = vsel %vm573_vm1, %v1213_v27, %v1217_v26  ;;  %v726_v27 = vshll.u32 %v4374_v3, 16 }
  0xc4   : > { %v1412_v51 = vpop.permute.xlu0 %1411  ;;  %917 = vrot.lane.b32.xlu1 %v882_v4, %s3638_s14  ;;  %v1739_v4 = vshll.u32 %v4343_v52, 16 }
  0xc6   : > { %915 = vrot.lane.b32.xlu0 %v879_v9, %s3638_s14  ;;  %v4331_v13 = vpop.permute.xlu1 %1525  ;;  %v1741_v22 = vrot.slane %v1739_v4, 1 }
  0xc8   : > { %v1524_v28 = vpop.permute.xlu0 %1523  ;;  %1029 = vrot.lane.b32.xlu1 %v3104_v15, %s3636_s12  ;;  %v1990_v15 = vsel %vm1984_vm4, %v1957_v49, %v4278_v57 }
  0xc9   : > { %v2023_v46 = vsel %vm2017_vm5, %v1990_v15, %v4296_v34  ;;  %v1959_v34 = vsel %vm1951_vm3, %v3828_v32, %v4255_v29 }
  0xca   : > { %1027 = vrot.lane.b32.xlu0 %v3103_v30, %s3636_s12  ;;  %v1798_v54 = vpop.permute.xlu1 %1797  ;;  %v2056_v57 = vsel %vm2050_vm6, %v2023_v46, %v1284_v63  ;;  %v721_v63 = vshll.u32 %v4354_v11, 16  ;;  %v1992_v9 = vsel %vm1984_vm4, %v1959_v34, %v4270_v1  ;;  %v4438_v34 = vld [vmem:[%s3735_s11 + $0xa0] sm:$0xf] }
  0xcb   : > { %v2089_v59 = vsel %vm2083_vm7, %v2056_v57, %v1412_v51  ;;  %v2025_v32 = vsel %vm2017_vm5, %v1992_v9, %v4290_v41  ;;  %v719_v41 = vshrl.u32 %v4354_v11, 16  ;;  %v1902_v57 = vrot.slane %v4351_v53, 1 }
  0xcc   : > { %v1796_v30 = vpop.permute.xlu0 %1795  ;;  %1301 = vrot.lane.b32.xlu1 %v1230_v39, %s3640_s27  ;;  %v2122_v12 = vsel %vm2116_vm8, %v2089_v59, %v1524_v28  ;;  %v2058_v62 = vsel %vm2050_vm6, %v2025_v32, %v4303_v40  ;;  %v723_v33 = vrot.slane %v721_v63, 1  ;;  %v4406_v40 = vld [vmem:[%s3735_s11 + $0xa4] ss:$0 sps:$4 sm:$0x11]   ;;  %v733_v28 = vshll.u32 %v4383_v8, 16 }
  0xcd   : > { %v2155_v29 = vsel %vm2149_vm9, %v2122_v12, %v1796_v30  ;;  %v2091_v26 = vsel %vm2083_vm7, %v2058_v62, %v4317_v35  ;;  %v1725_v35 = vor.u32 %v1724_v14, %v1720_v25  ;;  %v3040_v39 = vld [vmem:[%s3735_s11 + $0x9c] sm:$0xe]  ;;  %v738_v46 = vshll.u32 %v4406_v40, 16 }
  0xce   : > { %1299 = vrot.lane.b32.xlu0 %v1218_v56, %s3640_s27  ;;  %v4388_v0 = vpop.permute.xlu1 %774  ;;  %v2124_v21 = vsel %vm2116_vm8, %v2091_v26, %v4331_v13  ;;  %v1742_v56 = vsel %vm573_vm1, %v1737_v45, %v1741_v22  ;;  %v728_v13 = vrot.slane %v726_v27, 1  ;;  %v724_v19 = vor.u32 %v723_v33, %v719_v41  ;;  %v2941_v25 = vld [vmem:[%s3735_s11 + $0x9c] sm:$0xf]  ;;  %v3526_v22 = vld [vmem:[%s3735_s11 + $0xb0] ss:$0 sps:$4 sm:$0x11]  }
  0xcf   : > { %v2157_v47 = vsel %vm2149_vm9, %v2124_v21, %v1798_v54  ;;  %v731_v54 = vshrl.u32 %v4383_v8, 16  ;;  %v735_v44 = vrot.slane %v733_v28, 1  ;;  %v3184_v30 = vcombine.low %v3040_v39, %v4312_v55  ;;  %v3527_v41 = vld [vmem:[%s3735_s11 + $0xa4] ss:$0 sps:$4 sm:$0x11]  }
  0xd0   : > { %v1924_v51 = vpop.permute.xlu0 %1923  ;;  %1429 = vrot.lane.b32.xlu1 %v1394_v23, %s3637_s13  ;;  %v1730_v60 = vsel %vm573_vm1, %v1725_v35, %v1729_v42  ;;  %v3090_v59 = vcombine.low %v312_v58, %v4362_v18  ;;  %v729_v63 = vsel %vm573_vm1, %v724_v19, %v728_v13  ;;  %v740_v53 = vrot.slane %v738_v46, 1  ;;  %v2977_v21 = vld [vmem:[%s3735_s11 + $0x9c] sm:$0xe]  ;;  %v4469_v39 = vld [vmem:[%s3735_s11 + $0xb8] sm:$0xf] }
  0xd1   : > { %v2188_v1 = vsel %vm2182_vm10, %v2155_v29, %v1924_v51  ;;  %v736_v9 = vor.u32 %v735_v44, %v731_v54  ;;  %v1903_v16 = vsel %vm846_vm0, %v1901_v48, %v1902_v57  ;;  %v1904_v32 = vrot.slane %v3184_v30, 1  ;;  %v3005_v46 = vld [vmem:[%s3735_s11 + $0xa8] sm:$0xf] }
  0xd2   : > { %1427 = vrot.lane.b32.xlu0 %v1391_v5, %s3637_s13  ;;  %3278 = vmatprep.mubr.msk.bf16.mxu0 %vm2242_vm11, %v2188_v1  ;;  %v4411_v17 = vpop.permute.xlu1 %776  ;;  %v2944_v5 = vld [vmem:[%s3735_s11 + $0xac] sm:$0xf]  ;;  %v1905_v29 = vrot.slane %v4343_v52, 1  ;;  %v3105_v18 = vcombine.low %v2941_v25, %v4438_v34  ;;  %v887_v51 = vrot.slane %v4406_v40, 1  ;;  %v886_v62 = vrot.slane %v3090_v59, 1 }
  0xd3   : > { %v741_v45 = vsel %vm573_vm1, %v736_v9, %v740_v53  ;;  %v2978_v40 = vld [vmem:[%s3735_s11 + $0xa8] sm:$0xe]  ;;  %v1251_v42 = vshll.u32 %v3526_v22, 16  ;;  %v1239_v19 = vshll.u32 %v3527_v41, 16  ;;  %v3137_v44 = vcombine.low %v2977_v21, %v4438_v34 }
  0xd4   : > { %v1926_v49 = vpop.permute.xlu0 %1925  ;;  %1541 = vrot.lane.b32.xlu1 %v4322_v2, %s3641_s29  ;;  %v311_v2 = vld [vmem:[%s3735_s11 + $0x90] sm:$0xe]  ;;  %v1906_v26 = vsel %vm846_vm0, %v1904_v32, %v1905_v29  ;;  %v1234_v33 = vshll.u32 %v3105_v18, 16  ;;  %v888_v36 = vsel %vm846_vm0, %v886_v62, %v887_v51  ;;  %v1232_v13 = vshrl.u32 %v3105_v18, 16  ;;  %v279_v59 = vld [vmem:[%s3735_s11 + $0xa8] sm:$0xf] }
  0xd5   : > { %v2190_v15 = vsel %vm2182_vm10, %v2157_v47, %v1926_v49  ;;  %v3089_v55 = vcombine.low %v311_v2, %v4338_v10  ;;  %v3138_v47 = vcombine.low %v2978_v40, %v2944_v5  ;;  %v3007_v49 = vld [vmem:[%s3735_s11 + $0xb4] sm:$0xf]  ;;  %v4477_v2 = vld [vmem:[%s3735_s11 + $0xac] sm:$0xf]  ;;  %v1253_v48 = vrot.slane %v1251_v42, 1 }
  0xd6   : > { %1539 = vrot.lane.b32.xlu0 %v4334_v31, %s3641_s29  ;;  %3279 = vmatmul.mubr.msk.bf16.gmra.mrb[4].mxu0 %vm2242_vm11, %v2190_v15  ;;  %v4428_v23 = vpop.permute.xlu1 %905  ;;  %v2943_v31 = vld [vmem:[%s3735_s11 + $0xa8] sm:$0xf]  ;;  %v1236_v58 = vrot.slane %v1234_v33, 1  ;;  %v4481_v30 = vcombine.low %v3007_v49, %v4469_v39  ;;  %v4487_v34 = vcombine.low %v3005_v46, %v4477_v2  ;;  %v1399_v9 = vrot.slane %v3526_v22, 1 }
  0xd7   : > { %v3106_v12 = vcombine.low %v2943_v31, %v2944_v5  ;;  %v883_v1 = vrot.slane %v3089_v55, 1  ;;  %v1241_v5 = vrot.slane %v1239_v19, 1  ;;  %v1398_v25 = vrot.slane %v3138_v47, 1  ;;  %v4491_v55 = vld [vmem:[%s3735_s11 + $0xac] sm:$0xf] }
  0xd8   : > { %v4434_v4 = vpop.permute.xlu0 %903  ;;  %1813 = vrot.lane.b32.xlu1 %v1742_v56, %s3642_s7  ;;  %v1237_v31 = vor.u32 %v1236_v58, %v1232_v13  ;;  %v1395_v53 = vrot.slane %v3137_v44, 1  ;;  %v4494_v32 = vld [vmem:[%s3735_s11 + $0xbc] ss:$0 sps:$4 sm:$0x11]   ;;  %v1758_v29 = vshll.u32 %v4481_v30, 16  ;;  %v1961_v51 = vsel %vm1951_vm3, %v3892_v50, %v4388_v0 }
  0xd9   : > { %v1246_v52 = vshll.u32 %v3106_v12, 16  ;;  %v1244_v3 = vshrl.u32 %v3106_v12, 16  ;;  %v885_v56 = vsel %vm846_vm0, %v883_v1, %v884_v43  ;;  %v4507_v62 = vcombine.low %v279_v59, %v4491_v55  ;;  %v4515_v50 = vld [vmem:[%s3735_s11 + $0xb8] sm:$0xf]  ;;  %v3041_v46 = vld [vmem:[%s3735_s11 + $0xa8] sm:$0xe] }
  0xda   : > { %1811 = vrot.lane.b32.xlu0 %v1730_v60, %s3642_s7  ;;  %v4445_v14 = vpop.permute.xlu1 %1017  ;;  %v1994_v1 = vsel %vm1984_vm4, %v1961_v51, %v4434_v4  ;;  %v1242_v22 = vsel %vm573_vm1, %v1237_v31, %v1241_v5  ;;  %v1763_v40 = vshll.u32 %v4494_v32, 16  ;;  %v1760_v21 = vrot.slane %v1758_v29, 1  ;;  %v4559_v59 = vld [vmem:[%s3735_s11 + $0xbc] ss:$0 sps:$4 sm:$0x11]  }
  0xdb   : > { %v1248_v35 = vrot.slane %v1246_v52, 1  ;;  %v1746_v52 = vshll.u32 %v4487_v34, 16 }
  0xdc   : > { %v4450_v10 = vpop.permute.xlu0 %1015  ;;  %790 = vrot.lane.b32.xlu1 %v729_v63, %s3639_s17  ;;  %v1765_v44 = vrot.slane %v1763_v40, 1  ;;  %v2947_v40 = vld [vmem:[%s3735_s11 + $0xc0] sm:$0xf] }
  0xdd   : > { %v1249_v60 = vor.u32 %v1248_v35, %v1244_v3  ;;  %v2027_v0 = vsel %vm2017_vm5, %v1994_v1, %v4450_v10  ;;  %v1756_v3 = vshrl.u32 %v4481_v30, 16  ;;  %v4527_v35 = vld [vmem:[%s3735_s11 + $0xb0] ss:$0 sps:$4 sm:$0x11]   ;;  %v1963_v10 = vsel %vm1951_vm3, %v3906_v61, %v4411_v17 }
  0xde   : > { %1939 = vrot.lane.b32.xlu0 %v1903_v16, %s3643_s8  ;;  %v4458_v27 = vpop.permute.xlu1 %1289  ;;  %v1396_v16 = vrot.slane %v3527_v41, 1  ;;  %v1400_v41 = vsel %vm846_vm0, %v1398_v25, %v1399_v9  ;;  %v1996_v49 = vsel %vm1984_vm4, %v1963_v10, %v4428_v23  ;;  %v1748_v58 = vrot.slane %v1746_v52, 1  ;;  %v4593_v10 = vld [vmem:[%s3735_s11 + $0xb8] sm:$0xf] }
  0xdf   : > { %v1254_v43 = vsel %vm573_vm1, %v1249_v60, %v1253_v48  ;;  %v2029_v61 = vsel %vm2017_vm5, %v1996_v49, %v4445_v14  ;;  %v1761_v48 = vor.u32 %v1760_v21, %v1756_v3  ;;  %v750_v31 = vshll.u32 %v4527_v35, 16  ;;  %v313_v21 = vld [vmem:[%s3735_s11 + $0xa8] sm:$0xe] }
  0xe0   : > { %v1288_v28 = vpop.permute.xlu0 %1287  ;;  %792 = vrot.lane.b32.xlu1 %v741_v45, %s3639_s17  ;;  %v4504_v45 = vld [vmem:[%s3735_s11 + $0xb0] ss:$0 sps:$4 sm:$0x11]   ;;  %v1397_v33 = vsel %vm846_vm0, %v1395_v53, %v1396_v16  ;;  %v2062_v60 = vsel %vm2050_vm6, %v2029_v61, %v4458_v27  ;;  %v743_v14 = vshrl.u32 %v4507_v62, 16 }
  0xe1   : > { %v2060_v4 = vsel %vm2050_vm6, %v2027_v0, %v1288_v28  ;;  %v745_v28 = vshll.u32 %v4507_v62, 16  ;;  %v1751_v19 = vshll.u32 %v4504_v45, 16  ;;  %v314_v0 = vld [vmem:[%s3735_s11 + $0xb4] sm:$0xe] }
  0xe2   : > { %1941 = vrot.lane.b32.xlu0 %v1906_v26, %s3643_s8  ;;  %v4471_v15 = vpop.permute.xlu1 %1417  ;;  %v281_v26 = vld [vmem:[%s3735_s11 + $0xb4] sm:$0xf] }
  0xe3   : > { %v4536_v47 = vcombine.low %v281_v26, %v4515_v50  ;;  %v2095_v5 = vsel %vm2083_vm7, %v2062_v60, %v4471_v15  ;;  %v747_v25 = vrot.slane %v745_v28, 1  ;;  %v1753_v16 = vrot.slane %v1751_v19, 1  ;;  %v4611_v60 = vld [vmem:[%s3735_s11 + $0xc8] ss:$0 sps:$4 sm:$0x11]  }
  0xe4   : > { %v1416_v54 = vpop.permute.xlu0 %1415  ;;  %921 = vrot.lane.b32.xlu1 %v888_v36, %s3638_s14  ;;  %v1744_v36 = vshrl.u32 %v4487_v34, 16  ;;  %v3185_v15 = vcombine.low %v3041_v46, %v4477_v2  ;;  %v762_v26 = vshll.u32 %v4559_v59, 16  ;;  %v3092_v28 = vcombine.low %v314_v0, %v4515_v50 }
  0xe5   : > { %v2093_v42 = vsel %vm2083_vm7, %v2060_v4, %v1416_v54  ;;  %v757_v27 = vshll.u32 %v4536_v47, 16  ;;  %v748_v2 = vor.u32 %v747_v25, %v743_v14  ;;  %v4586_v4 = vld [vmem:[%s3735_s11 + $0xc4] sm:$0xf]  ;;  %v893_v46 = vrot.slane %v4559_v59, 1  ;;  %v2979_v59 = vld [vmem:[%s3735_s11 + $0xb4] sm:$0xe] }
  0xe6   : > { %919 = vrot.lane.b32.xlu0 %v885_v56, %s3638_s14  ;;  %v4484_v57 = vpop.permute.xlu1 %1529  ;;  %v1749_v53 = vor.u32 %v1748_v58, %v1744_v36  ;;  %v2945_v36 = vld [vmem:[%s3735_s11 + $0xb4] sm:$0xf]  ;;  %v764_v49 = vrot.slane %v762_v26, 1  ;;  %v3545_v14 = vld [vmem:[%s3735_s11 + $0xbc] ss:$0 sps:$4 sm:$0x11]  }
  0xe7   : > { %v759_v52 = vrot.slane %v757_v27, 1  ;;  %v4633_v26 = vld [vmem:[%s3735_s11 + $0xc4] sm:$0xf] }
  0xe8   : > { %v1528_v63 = vpop.permute.xlu0 %1527  ;;  %1033 = vrot.lane.b32.xlu1 %v3106_v12, %s3636_s12 }
  0xe9   : > { %v2126_v56 = vsel %vm2116_vm8, %v2093_v42, %v1528_v63  ;;  %v2128_v63 = vsel %vm2116_vm8, %v2095_v5, %v4484_v57  ;;  %v1766_v57 = vsel %vm573_vm1, %v1761_v48, %v1765_v44  ;;  %v1911_v42 = vrot.slane %v4494_v32, 1 }
  0xea   : > { %1031 = vrot.lane.b32.xlu0 %v3105_v18, %s3636_s12  ;;  %v1802_v12 = vpop.permute.xlu1 %1801  ;;  %v3107_v32 = vcombine.low %v2945_v36, %v4593_v10  ;;  %v892_v44 = vrot.slane %v3092_v28, 1  ;;  %v890_v5 = vrot.slane %v4527_v35, 1 }
  0xeb   : > { %v2161_v29 = vsel %vm2149_vm9, %v2128_v63, %v1802_v12  ;;  %v755_v12 = vshrl.u32 %v4536_v47, 16  ;;  %v2980_v63 = vld [vmem:[%s3735_s11 + $0xc0] sm:$0xe] }
  0xec   : > { %v1800_v18 = vpop.permute.xlu0 %1799  ;;  %1305 = vrot.lane.b32.xlu1 %v1254_v43, %s3640_s27  ;;  %v3042_v43 = vld [vmem:[%s3735_s11 + $0xb4] sm:$0xe]  ;;  %v1258_v25 = vshll.u32 %v3107_v32, 16  ;;  %v3140_v0 = vcombine.low %v2980_v63, %v4586_v4  ;;  %v3555_v63 = vld [vmem:[%s4976_s3 + $0x8] sm:$0xff]  }
  0xed   : > { %v2159_v17 = vsel %vm2149_vm9, %v2126_v56, %v1800_v18  ;;  %v1754_v18 = vsel %vm573_vm1, %v1749_v53, %v1753_v16  ;;  %v3108_v56 = vcombine.low %v2947_v40, %v4586_v4  ;;  %v894_v53 = vsel %vm846_vm0, %v892_v44, %v893_v46 }
  0xee   : > { %1303 = vrot.lane.b32.xlu0 %v1242_v22, %s3640_s27  ;;  %v4541_v13 = vpop.permute.xlu1 %778  ;;  %v752_v22 = vrot.slane %v750_v31, 1  ;;  %v1404_v4 = vrot.slane %v3140_v0, 1 }
  0xef   : > { %v1268_v16 = vshrl.u32 %v3108_v56, 16 }
  0xf0   : > { %v1928_v54 = vpop.permute.xlu0 %1927  ;;  %1433 = vrot.lane.b32.xlu1 %v1400_v41, %s3637_s13  ;;  %v1907_v41 = vrot.slane %v3185_v15, 1 }
  0xf1   : > { %v2192_v23 = vsel %vm2182_vm10, %v2159_v17, %v1928_v54  ;;  %v3091_v17 = vcombine.low %v313_v21, %v4491_v55 }
  0xf2   : > { %1431 = vrot.lane.b32.xlu0 %v1397_v33, %s3637_s13  ;;  %3282 = vmatprep.mubr.msk.bf16.mxu0 %vm2242_vm11, %v2192_v23  ;;  %v4564_v9 = vpop.permute.xlu1 %780  ;;  %v1908_v33 = vrot.slane %v4504_v45, 1  ;;  %v760_v45 = vor.u32 %v759_v52, %v755_v12  ;;  %v1270_v23 = vshll.u32 %v3108_v56, 16  ;;  %v3009_v52 = vld [vmem:[%s3735_s11 + $0xc0] sm:$0xf] }
  0xf3   : > { %v889_v31 = vrot.slane %v3091_v17, 1 }
  0xf4   : > { %v1930_v51 = vpop.permute.xlu0 %1929  ;;  %1545 = vrot.lane.b32.xlu1 %v4481_v30, %s3641_s29  ;;  %v1909_v19 = vsel %vm846_vm0, %v1907_v41, %v1908_v33  ;;  %v765_v54 = vsel %vm573_vm1, %v760_v45, %v764_v49  ;;  %v1272_v15 = vrot.slane %v1270_v23, 1  ;;  %v1402_v49 = vrot.slane %v3545_v14, 1 }
  0xf5   : > { %v2194_v1 = vsel %vm2182_vm10, %v2161_v29, %v1930_v51  ;;  %v1275_v29 = vshll.u32 %v4611_v60, 16  ;;  %v3011_v51 = vld [vmem:[%s3735_s11 + $0xcc] sm:$0xf] }
  0xf6   : > { %1543 = vrot.lane.b32.xlu0 %v4487_v34, %s3641_s29  ;;  %3283 = vmatmul.mubr.msk.bf16.gmra.mrb[8].mxu0 %vm2242_vm11, %v2194_v1  ;;  %v4579_v30 = vpop.permute.xlu1 %909  ;;  %v3186_v34 = vcombine.low %v3042_v43, %v4469_v39  ;;  %v753_v39 = vsel %vm573_vm1, %v748_v2, %v752_v22  ;;  %v891_v43 = vsel %vm846_vm0, %v889_v31, %v890_v5  ;;  %v1256_v1 = vshrl.u32 %v3107_v32, 16  ;;  %v4629_v2 = vld [vmem:[%s3735_s11 + $0xd0] sm:$0xf] }
  0xf7   : > { %v1263_v22 = vshll.u32 %v3545_v14, 16  ;;  %v1273_v41 = vor.u32 %v1272_v15, %v1268_v16  ;;  %v1277_v33 = vrot.slane %v1275_v29, 1 }
  0xf8   : > { %v4588_v3 = vpop.permute.xlu0 %907  ;;  %1817 = vrot.lane.b32.xlu1 %v1766_v57, %s3642_s7  ;;  %v1910_v61 = vrot.slane %v3186_v34, 1  ;;  %v1260_v57 = vrot.slane %v1258_v25, 1  ;;  %v4640_v34 = vcombine.low %v3011_v51, %v4629_v2 }
  0xf9   : > { %v1265_v36 = vrot.slane %v1263_v22, 1 }
  0xfa   : > { %1815 = vrot.lane.b32.xlu0 %v1754_v18, %s3642_s7  ;;  %v4601_v58 = vpop.permute.xlu1 %1021  ;;  %v1912_v55 = vsel %vm846_vm0, %v1910_v61, %v1911_v42  ;;  %v3139_v18 = vcombine.low %v2979_v59, %v4593_v10  ;;  %v1261_v21 = vor.u32 %v1260_v57, %v1256_v1  ;;  %v4643_v42 = vcombine.low %v3009_v52, %v4633_v26  ;;  %v3043_v1 = vld [vmem:[%s3735_s11 + $0xc0] sm:$0xe] }
  0xfb   : > { %v1405_v10 = vrot.slane %v4611_v60, 1  ;;  %v1278_v61 = vsel %vm573_vm1, %v1273_v41, %v1277_v33  ;;  %v1782_v17 = vshll.u32 %v4640_v34, 16  ;;  %v4663_v60 = vld [vmem:[%s3735_s11 + $0xc8] ss:$0 sps:$4 sm:$0x11]   ;;  %v1780_v23 = vshrl.u32 %v4640_v34, 16 }
  0xfc   : > { %v1020_v50 = vpop.permute.xlu0 %1019  ;;  %794 = vrot.lane.b32.xlu1 %v753_v39, %s3639_s17  ;;  %v4646_v39 = vld [vmem:[%s3735_s11 + $0xd4] ss:$0 sps:$4 sm:$0x11]   ;;  %v1401_v45 = vrot.slane %v3139_v18, 1  ;;  %v1266_v46 = vsel %vm573_vm1, %v1261_v21, %v1265_v36  ;;  %v3187_v33 = vcombine.low %v3043_v1, %v4633_v26 }
  0xfd   : > { %v1787_v5 = vshll.u32 %v4646_v39, 16  ;;  %v1784_v25 = vrot.slane %v1782_v17, 1 }
  0xfe   : > { %1943 = vrot.lane.b32.xlu0 %v1909_v19, %s3643_s8  ;;  %v4613_v48 = vpop.permute.xlu1 %1293  ;;  %v1965_v19 = vsel %vm1951_vm3, %v3968_v20, %v4541_v13  ;;  %v1770_v20 = vshll.u32 %v4643_v42, 16  ;;  %v1403_v31 = vsel %vm846_vm0, %v1401_v45, %v1402_v49  ;;  %v1914_v45 = vrot.slane %v4663_v60, 1 }
 0x100   : > { %v1292_v27 = vpop.permute.xlu0 %1291  ;;  %796 = vrot.lane.b32.xlu1 %v765_v54, %s3639_s17  ;;  %v3554_v54 = vld [vmem:[%s4976_s3] sm:$0xff]   ;;  %v1772_v15 = vrot.slane %v1770_v20, 1 }
 0x101   : > { %3306 = vmatprep.subr.bf16.mxu1 %v3554_v54 }
 0x102   : > { %1945 = vrot.lane.b32.xlu0 %v1912_v55, %s3643_s8  ;;  %v4625_v35 = vpop.permute.xlu1 %1421  ;;  %3307 = vmatpush3.bf16.msra.mxu1 %v3554_v54 }
 0x103   : > { %3308 = vmatprep.subr.bf16.mxu1 %v3555_v63 }
 0x104   : > { %v1420_v12 = vpop.permute.xlu0 %1419  ;;  %925 = vrot.lane.b32.xlu1 %v894_v53, %s3638_s14 }
 0x106   : > { %923 = vrot.lane.b32.xlu0 %v891_v43, %s3638_s14  ;;  %v1534_v40 = vpop.permute.xlu1 %1533  ;;  %3309 = vmatpush3.bf16.msra.mxu1 %v3555_v63  ;;  %s2825_s14 = scalar_lea.sflag [#allocation3], %s239_s25 }
 0x108   : > { %v1532_v28 = vpop.permute.xlu0 %1531  ;;  %1037 = vrot.lane.b32.xlu1 %v3108_v56, %s3636_s12  ;;  %v1998_v56 = vsel %vm1984_vm4, %v1965_v19, %v4588_v3  ;;  %v1406_v3 = vsel %vm846_vm0, %v1404_v4, %v1405_v10  ;;  %v1913_v10 = vrot.slane %v3187_v33, 1 }
 0x109   : > { %v2031_v13 = vsel %vm2017_vm5, %v1998_v56, %v1020_v50  ;;  %v1967_v50 = vsel %vm1951_vm3, %v3989_v37, %v4564_v9  ;;  %v1775_v37 = vshll.u32 %v4663_v60, 16  ;;  %v3044_v9 = vld [vmem:[%s3735_s11 + $0xcc] sm:$0xe] }
 0x10a   : > { %1035 = vrot.lane.b32.xlu0 %v3107_v32, %s3636_s12  ;;  %v1806_v44 = vpop.permute.xlu1 %1805  ;;  %v2064_v55 = vsel %vm2050_vm6, %v2031_v13, %v1292_v27  ;;  %v1768_v27 = vshrl.u32 %v4643_v42, 16  ;;  %v2000_v59 = vsel %vm1984_vm4, %v1967_v50, %v4579_v30  ;;  %v3188_v52 = vcombine.low %v3044_v9, %v4629_v2 }
 0x10b   : > { %v2097_v14 = vsel %vm2083_vm7, %v2064_v55, %v1420_v12  ;;  %v2033_v29 = vsel %vm2017_vm5, %v2000_v59, %v4601_v58  ;;  %v1785_v58 = vor.u32 %v1784_v25, %v1780_v23  ;;  %v1789_v12 = vrot.slane %v1787_v5, 1 }
 0x10c   : > { %v1804_v32 = vpop.permute.xlu0 %1803  ;;  %1309 = vrot.lane.b32.xlu1 %v1278_v61, %s3640_s27  ;;  %v2130_v53 = vsel %vm2116_vm8, %v2097_v14, %v1532_v28  ;;  %v2066_v57 = vsel %vm2050_vm6, %v2033_v29, %v4613_v48  ;;  %v1773_v48 = vor.u32 %v1772_v15, %v1768_v27  ;;  %v1777_v41 = vrot.slane %v1775_v37, 1 }
 0x10d   : > { %v2163_v51 = vsel %vm2149_vm9, %v2130_v53, %v1804_v32  ;;  %v2099_v22 = vsel %vm2083_vm7, %v2066_v57, %v4625_v35  ;;  %v1790_v2 = vsel %vm573_vm1, %v1785_v58, %v1789_v12  ;;  %v1917_v28 = vrot.slane %v4646_v39, 1 }
 0x10e   : > { %1307 = vrot.lane.b32.xlu0 %v1266_v46, %s3640_s27  ;;  %v783_v16 = vpop.permute.xlu1 %782  ;;  %v2132_v0 = vsel %vm2116_vm8, %v2099_v22, %v1534_v40  ;;  %v1916_v40 = vrot.slane %v3188_v52, 1  ;;  %v1778_v26 = vsel %vm573_vm1, %v1773_v48, %v1777_v41  ;;  %v1915_v19 = vsel %vm846_vm0, %v1913_v10, %v1914_v45  ;;  %s3228_s27 = sshll.u32 %s3626_s21, 4  ;;  %s3644_s21 = smov [#allocation2]  }
 0x10f   : > { %v2165_v21 = vsel %vm2149_vm9, %v2132_v0, %v1806_v44  ;;  %v1969_v60 = vsel %vm1951_vm3, %v4063_v6, %v783_v16  ;;  %s4926_s10 = scalar_lea.hbm %s4978_s5, %s3228_s27  ;;  %s3560_s12 = sshll.u32 %s3644_s21, 4  ;;  %s3561_s12 = int_to_ptr.vmem [resolvable:$false] %s3560_s12 }
 0x110   : > { %v1932_v43 = vpop.permute.xlu0 %1931  ;;  %1437 = vrot.lane.b32.xlu1 %v1406_v3, %s3637_s13  ;;  %s3562_s16 = scalar_lea.vmem %s3561_s12, 32 }
 0x111   : > { %v2196_v30 = vsel %vm2182_vm10, %v2163_v51, %v1932_v43 }
 0x112   : > { %1435 = vrot.lane.b32.xlu0 %v1403_v31, %s3637_s13  ;;  %3286 = vmatprep.mubr.msk.bf16.mxu0 %vm2242_vm11, %v2196_v30  ;;  %v785_v18 = vpop.permute.xlu1 %784 }
 0x113   : > { %v1971_v3 = vsel %vm1951_vm3, %v4080_v24, %v785_v18 }
 0x114   : > { %v1934_v36 = vpop.permute.xlu0 %1933  ;;  %1549 = vrot.lane.b32.xlu1 %v4640_v34, %s3641_s29  ;;  %v1918_v34 = vsel %vm846_vm0, %v1916_v40, %v1917_v28 }
 0x115   : > { %v2198_v35 = vsel %vm2182_vm10, %v2165_v21, %v1934_v36 }
 0x116   : > { %1547 = vrot.lane.b32.xlu0 %v4643_v42, %s3641_s29  ;;  %3287 = vmatmul.mubr.msk.bf16.gmra.mrb[12].mxu0 %vm2242_vm11, %v2198_v35  ;;  %v914_v4 = vpop.permute.xlu1 %913  ;;  %s240_s29 = scalar_lea.vmem [#allocation2], %s239_s25 }
 0x117   : > { %v2004_v5 = vsel %vm1984_vm4, %v1971_v3, %v914_v4 }
 0x118   : > { %v912_v49 = vpop.permute.xlu0 %911  ;;  %1821 = vrot.lane.b32.xlu1 %v1790_v2, %s3642_s7 }
 0x119   : > { %v2002_v20 = vsel %vm1984_vm4, %v1969_v60, %v912_v49 }
 0x11a   : > { %1819 = vrot.lane.b32.xlu0 %v1778_v26, %s3642_s7  ;;  %v1026_v42 = vpop.permute.xlu1 %1025  ;;  %s2838_s7 = sshll.u32 %s240_s29, 4  ;;  %s4928_s7 = int_to_ptr.vmem [resolvable:$true] %s2838_s7 }
 0x11b   : > { %v2037_v6 = vsel %vm2017_vm5, %v2004_v5, %v1026_v42  ;;  %s3556_s15 = scalar_lea.vmem %s4928_s7, 16  ;;  %p3563_p1 = scmp.lt.s32.totalorder %s4928_s7, %s3561_s12 }
 0x11c   : > { %v1024_v61 = vpop.permute.xlu0 %1023  ;;  %1949 = vrot.lane.b32.xlu1 %v1918_v34, %s3643_s8  ;;  %p3557_p12 = scmp.ne.s32.totalorder %s4928_s7, %s3556_s15  ;;  %p3564_p2 = scmp.lt.s32.totalorder %s3562_s16, %s3556_s15 }
 0x11d   : > { %v2035_v32 = vsel %vm2017_vm5, %v2002_v20, %v1024_v61 }
 0x11e   : > { %1947 = vrot.lane.b32.xlu0 %v1915_v19, %s3643_s8  ;;  %v1298_v39 = vpop.permute.xlu1 %1297  ;;  %p3558_p13 = pnand %p3557_p12, %p3715_p4  ;;  %p3565_p3 = por %p3564_p2, %p3563_p1 }
 0x11f   : > { %v2070_v63 = vsel %vm2050_vm6, %v2037_v6, %v1298_v39 }
 0x120   : > { %v1296_v17 = vpop.permute.xlu0 %1295  ;;  %p3559_p0 = pneg %p3558_p13 }
 0x121   : > { %v2068_v55 = vsel %vm2050_vm6, %v2035_v32, %v1296_v17 }
 0x122   : > { %v1426_v54 = vpop.permute.xlu1 %1425  ;;  %p3566_p5 = pnand %p3565_p3, %p3559_p0 }
 0x123   : > { %v2103_v53 = vsel %vm2083_vm7, %v2070_v63, %v1426_v54 }
 0x124   : > { %v1424_v56 = vpop.permute.xlu0 %1423 }
 0x125   : > { %v2101_v31 = vsel %vm2083_vm7, %v2068_v55, %v1424_v56 }
 0x126   : > { %v1538_v44 = vpop.permute.xlu1 %1537 }
 0x127   : > { %v2136_v24 = vsel %vm2116_vm8, %v2103_v53, %v1538_v44 }
 0x128   : > { %v1536_v46 = vpop.permute.xlu0 %1535 }
 0x129   : > { %v2134_v50 = vsel %vm2116_vm8, %v2101_v31, %v1536_v46 }
 0x12a   : > { %v1810_v13 = vpop.permute.xlu1 %1809 }
 0x12b   : > { %v2169_v15 = vsel %vm2149_vm9, %v2136_v24, %v1810_v13 }
 0x12c   : > { %v1808_v23 = vpop.permute.xlu0 %1807 }
 0x12d   : > { %v2167_v25 = vsel %vm2149_vm9, %v2134_v50, %v1808_v23 }
 0x12e   : > { %v787_v14 = vpop.permute.xlu1 %786 }
 0x12f   : > { %v1973_v0 = vsel %vm1951_vm3, %v4206_v7, %v787_v14 }
 0x130   : > { %v1936_v27 = vpop.permute.xlu0 %1935 }
 0x131   : > { %v2200_v59 = vsel %vm2182_vm10, %v2167_v25, %v1936_v27 }
 0x132   : > { %3290 = vmatprep.mubr.msk.bf16.mxu0 %vm2242_vm11, %v2200_v59  ;;  %v789_v16 = vpop.permute.xlu1 %788 }
 0x133   : > { %v1975_v36 = vsel %vm1951_vm3, %v4230_v38, %v789_v16 }
 0x134   : > { %v1938_v37 = vpop.permute.xlu0 %1937 }
 0x135   : > { %v2202_v9 = vsel %vm2182_vm10, %v2169_v15, %v1938_v37 }
 0x136   : > { %3291 = vmatmul.mubr.msk.bf16.gmra.mrb[16].mxu0 %vm2242_vm11, %v2202_v9  ;;  %v918_v29 = vpop.permute.xlu1 %917 }
 0x137   : > { %v2008_v2 = vsel %vm1984_vm4, %v1975_v36, %v918_v29 }
 0x138   : > { %v916_v51 = vpop.permute.xlu0 %915 }
 0x139   : > { %v2006_v18 = vsel %vm1984_vm4, %v1973_v0, %v916_v51 }
 0x13a   : > { %v1030_v43 = vpop.permute.xlu1 %1029 }
 0x13b   : > { %v2041_v7 = vsel %vm2017_vm5, %v2008_v2, %v1030_v43 }
 0x13c   : > { %v1028_v1 = vpop.permute.xlu0 %1027 }
 0x13d   : > { %v2039_v41 = vsel %vm2017_vm5, %v2006_v18, %v1028_v1  ;;  %v4782_v18 = vld [vmem:[%s4975_s2] ss:$0 sm:$0xff] }
 0x13e   : > { %v1302_v57 = vpop.permute.xlu1 %1301 }
 0x13f   : > { %v2074_v10 = vsel %vm2050_vm6, %v2041_v7, %v1302_v57 }
 0x140   : > { %v1300_v30 = vpop.permute.xlu0 %1299 }
 0x141   : > { %v2072_v21 = vsel %vm2050_vm6, %v2039_v41, %v1300_v30 }
 0x142   : > { %v1430_v22 = vpop.permute.xlu1 %1429 }
 0x143   : > { %v2107_v49 = vsel %vm2083_vm7, %v2074_v10, %v1430_v22 }
 0x144   : > { %v1428_v58 = vpop.permute.xlu0 %1427 }
 0x145   : > { %v2105_v35 = vsel %vm2083_vm7, %v2072_v21, %v1428_v58 }
 0x146   : > { %v1542_v12 = vpop.permute.xlu1 %1541 }
 0x147   : > { %v2140_v38 = vsel %vm2116_vm8, %v2107_v49, %v1542_v12 }
 0x148   : > { %v1540_v52 = vpop.permute.xlu0 %1539 }
 0x149   : > { %v2138_v40 = vsel %vm2116_vm8, %v2105_v35, %v1540_v52 }
 0x14a   : > { %v1814_v48 = vpop.permute.xlu1 %1813 }
 0x14b   : > { %v2173_v42 = vsel %vm2149_vm9, %v2140_v38, %v1814_v48 }
 0x14c   : > { %v1812_v33 = vpop.permute.xlu0 %1811 }
 0x14d   : > { %v2171_v4 = vsel %vm2149_vm9, %v2138_v40, %v1812_v33 }
 0x14e   : > { %v791_v28 = vpop.permute.xlu1 %790 }
 0x14f   : > { %v1977_v23 = vsel %vm1951_vm3, %v4354_v11, %v791_v28 }
 0x150   : > { %v1940_v26 = vpop.permute.xlu0 %1939 }
 0x151   : > { %v2204_v45 = vsel %vm2182_vm10, %v2171_v4, %v1940_v26 }
 0x152   : > { %3294 = vmatprep.mubr.msk.bf16.mxu0 %vm2242_vm11, %v2204_v45  ;;  %v793_v34 = vpop.permute.xlu1 %792 }
 0x153   : > { %v1979_v14 = vsel %vm1951_vm3, %v4383_v8, %v793_v34 }
 0x154   : > { %v1942_v19 = vpop.permute.xlu0 %1941 }
 0x155   : > { %v2206_v61 = vsel %vm2182_vm10, %v2173_v42, %v1942_v19 }
 0x156   : > { %3295 = vmatmul.mubr.msk.bf16.gmra.mrb[20].mxu0 %vm2242_vm11, %v2206_v61  ;;  %v922_v39 = vpop.permute.xlu1 %921 }
 0x157   : > { %v2012_v25 = vsel %vm1984_vm4, %v1979_v14, %v922_v39 }
 0x158   : > { %v920_v17 = vpop.permute.xlu0 %919 }
 0x159   : > { %v2010_v55 = vsel %vm1984_vm4, %v1977_v23, %v920_v17 }
 0x15a   : > { %v1034_v54 = vpop.permute.xlu1 %1033 }
 0x15b   : > { %v2045_v11 = vsel %vm2017_vm5, %v2012_v25, %v1034_v54 }
 0x15c   : > { %v1032_v56 = vpop.permute.xlu0 %1031 }
 0x15d   : > { %v2043_v31 = vsel %vm2017_vm5, %v2010_v55, %v1032_v56 }
 0x15e   : > { %v1306_v44 = vpop.permute.xlu1 %1305 }
 0x15f   : > { %v2078_v24 = vsel %vm2050_vm6, %v2045_v11, %v1306_v44 }
 0x160   : > { %v1304_v46 = vpop.permute.xlu0 %1303 }
 0x161   : > { %v2076_v50 = vsel %vm2050_vm6, %v2043_v31, %v1304_v46 }
 0x162   : > { %v1434_v60 = vpop.permute.xlu1 %1433 }
 0x163   : > { %v2111_v15 = vsel %vm2083_vm7, %v2078_v24, %v1434_v60 }
 0x164   : > { %v1432_v20 = vpop.permute.xlu0 %1431 }
 0x165   : > { %v2109_v6 = vsel %vm2083_vm7, %v2076_v50, %v1432_v20 }
 0x166   : > { %v1546_v13 = vpop.permute.xlu1 %1545 }
 0x167   : > { %v2144_v8 = vsel %vm2116_vm8, %v2111_v15, %v1546_v13 }
 0x168   : > { %v1544_v32 = vpop.permute.xlu0 %1543 }
 0x169   : > { %v2142_v27 = vsel %vm2116_vm8, %v2109_v6, %v1544_v32 }
 0x16a   : > { %v1818_v3 = vpop.permute.xlu1 %1817 }
 0x16b   : > { %v2177_v9 = vsel %vm2149_vm9, %v2144_v8, %v1818_v3 }
 0x16c   : > { %v1816_v5 = vpop.permute.xlu0 %1815 }
 0x16d   : > { %v2175_v59 = vsel %vm2149_vm9, %v2142_v27, %v1816_v5 }
 0x16e   : > { %v795_v63 = vpop.permute.xlu1 %794 }
 0x16f   : > { %v1981_v21 = vsel %vm1951_vm3, %v4507_v62, %v795_v63 }
 0x170   : > { %v1944_v53 = vpop.permute.xlu0 %1943 }
 0x171   : > { %v2208_v16 = vsel %vm2182_vm10, %v2175_v59, %v1944_v53 }
 0x172   : > { %3298 = vmatprep.mubr.msk.bf16.mxu0 %vm2242_vm11, %v2208_v16  ;;  %v797_v37 = vpop.permute.xlu1 %796 }
 0x173   : > { %v1983_v41 = vsel %vm1951_vm3, %v4536_v47, %v797_v37 }
 0x174   : > { %v1946_v29 = vpop.permute.xlu0 %1945 }
 0x175   : > { %v2210_v51 = vsel %vm2182_vm10, %v2177_v9, %v1946_v29 }
 0x176   : > { %3299 = vmatmul.mubr.msk.bf16.gmra.mrb[24].mxu0 %vm2242_vm11, %v2210_v51  ;;  %v926_v43 = vpop.permute.xlu1 %925 }
 0x177   : > { %v2016_v36 = vsel %vm1984_vm4, %v1983_v41, %v926_v43 }
 0x178   : > { %v924_v1 = vpop.permute.xlu0 %923 }
 0x179   : > { %v2014_v40 = vsel %vm1984_vm4, %v1981_v21, %v924_v1 }
 0x17a   : > { %v1038_v57 = vpop.permute.xlu1 %1037 }
 0x17b   : > { %v2049_v28 = vsel %vm2017_vm5, %v2016_v36, %v1038_v57 }
 0x17c   : > { %v1036_v30 = vpop.permute.xlu0 %1035 }
 0x17d   : > { %v2047_v10 = vsel %vm2017_vm5, %v2014_v40, %v1036_v30 }
 0x17e   : > { %v1310_v22 = vpop.permute.xlu1 %1309 }
 0x17f   : > { %v2082_v47 = vsel %vm2050_vm6, %v2049_v28, %v1310_v22 }
 0x180   : > { %v1308_v58 = vpop.permute.xlu0 %1307 }
 0x181   : > { %v2080_v38 = vsel %vm2050_vm6, %v2047_v10, %v1308_v58 }
 0x182   : > { %v1438_v12 = vpop.permute.xlu1 %1437 }
 0x183   : > { %v2115_v34 = vsel %vm2083_vm7, %v2082_v47, %v1438_v12 }
 0x184   : > { %v1436_v52 = vpop.permute.xlu0 %1435 }
 0x185   : > { %v2113_v19 = vsel %vm2083_vm7, %v2080_v38, %v1436_v52 }
 0x186   : > { %v1550_v0 = vpop.permute.xlu1 %1549 }
 0x187   : > { %v2148_v61 = vsel %vm2116_vm8, %v2115_v34, %v1550_v0 }
 0x188   : > { %v1548_v48 = vpop.permute.xlu0 %1547 }
 0x189   : > { %v3276_v33 = vpop.f32.mrb[0].mxu0  ;;  %v2146_v54 = vsel %vm2116_vm8, %v2113_v19, %v1548_v48 }
 0x18a   : > { %v2322_v35 = vadd.f32 %v3276_v33, %v4782_v18  ;;  %v2313_v2 = vpop.f32.mrb[1].mxu0  ;;  %v1822_v26 = vpop.permute.xlu1 %1821 }
 0x18b   : > { %v2314_v7 = vadd.f32 %v4782_v18, %v2313_v2  ;;  %v3277_v4 = vpop.f32.mrb[2].mxu0  ;;  %v2181_v44 = vsel %vm2149_vm9, %v2148_v61, %v1822_v26 }
 0x18c   : > { %v2325_v45 = vadd.f32 %v3277_v4, %v4782_v18  ;;  %v2316_v62 = vpop.f32.mrb[3].mxu0  ;;  %v1820_v49 = vpop.permute.xlu0 %1819  ;;  %v2442_v39 = vmax.f32 %v2322_v35, 0.0 }
 0x18d   : > { %v2317_v42 = vadd.f32 %v4782_v18, %v2316_v62  ;;  %v2440_v56 = vmax.f32 %v2314_v7, 0.0  ;;  %v2179_v13 = vsel %vm2149_vm9, %v2146_v54, %v1820_v49 }
 0x18e   : > { %v2443_v17 = vmax.f32 %v2325_v45, 0.0  ;;  %v1950_v60 = vpop.permute.xlu1 %1949 }
 0x18f   : > { %v2441_v46 = vmax.f32 %v2317_v42, 0.0  ;;  %v2214_v32 = vsel %vm2182_vm10, %v2181_v44, %v1950_v60 }
 0x190   : > { %v2473_v20 = vpack.c.bf16 %v2443_v17, %v2442_v39  ;;  %v1948_v23 = vpop.permute.xlu0 %1947 }
 0x191   : > { %v2212_v55 = vsel %vm2182_vm10, %v2179_v13, %v1948_v23  ;;  %v2472_v3 = vpack.c.bf16 %v2441_v46, %v2440_v56 }
 0x192   : > { %3302 = vmatprep.mubr.msk.bf16.mxu0 %vm2242_vm11, %v2212_v55 }
 0x193   : > { %3303 = vmatmul.mubr.msk.bf16.gmra.mrb[28].mxu0 %vm2242_vm11, %v2214_v32  ;;  %3310 = vmatprep.mubr.msk.bf16.mxu1 %vm2182_vm10, %v2472_v3 }
 0x194   : > { %3311 = vmatmul.mubr.msk.bf16.vlgmr.msra.gmra.mrb[0].mxu1 %vm2182_vm10, %v2473_v20 }
 0x1a9   : > { %v3280_v31 = vpop.f32.mrb[4].mxu0 }
 0x1aa   : > { %v2338_v5 = vadd.f32 %v3280_v31, %v4782_v18  ;;  %v2329_v50 = vpop.f32.mrb[5].mxu0 }
 0x1ab   : > { %v2330_v14 = vadd.f32 %v4782_v18, %v2329_v50  ;;  %v3281_v6 = vpop.f32.mrb[6].mxu0 }
 0x1ac   : > { %v2341_v25 = vadd.f32 %v3281_v6, %v4782_v18  ;;  %v2332_v27 = vpop.f32.mrb[7].mxu0  ;;  %v2446_v11 = vmax.f32 %v2338_v5, 0.0 }
 0x1ad   : > { %v2333_v63 = vadd.f32 %v4782_v18, %v2332_v27  ;;  %v2444_v53 = vmax.f32 %v2330_v14, 0.0 }
 0x1ae   : > { %v2447_v59 = vmax.f32 %v2341_v25, 0.0 }
 0x1af   : > { %v2445_v24 = vmax.f32 %v2333_v63, 0.0 }
 0x1b0   : > { %v2475_v16 = vpack.c.bf16 %v2447_v59, %v2446_v11 }
 0x1b1   : > { %v2474_v15 = vpack.c.bf16 %v2445_v24, %v2444_v53 }
 0x1b3   : > { %3314 = vmatprep.mubr.msk.bf16.mxu1 %vm2182_vm10, %v2474_v15 }
 0x1b4   : > { %3315 = vmatmul.mubr.msk.bf16.gmra.mrb[4].mxu1 %vm2182_vm10, %v2475_v16 }
 0x1c9   : > { %v3284_v8 = vpop.f32.mrb[8].mxu0 }
 0x1ca   : > { %v2354_v37 = vadd.f32 %v3284_v8, %v4782_v18  ;;  %v2345_v9 = vpop.f32.mrb[9].mxu0 }
 0x1cb   : > { %v2346_v29 = vadd.f32 %v4782_v18, %v2345_v9  ;;  %v3285_v51 = vpop.f32.mrb[10].mxu0 }
 0x1cc   : > { %v2357_v43 = vadd.f32 %v3285_v51, %v4782_v18  ;;  %v2348_v1 = vpop.f32.mrb[11].mxu0  ;;  %v2450_v30 = vmax.f32 %v2354_v37, 0.0 }
 0x1cd   : > { %v2349_v57 = vadd.f32 %v4782_v18, %v2348_v1  ;;  %v2448_v58 = vmax.f32 %v2346_v29, 0.0 }
 0x1ce   : > { %v2451_v22 = vmax.f32 %v2357_v43, 0.0 }
 0x1cf   : > { %v2449_v12 = vmax.f32 %v2349_v57, 0.0 }
 0x1d0   : > { %v2477_v52 = vpack.c.bf16 %v2451_v22, %v2450_v30  ;;  %v4849_v30 = vld [vmem:[%s4977_s4] ss:$0 sm:$0xff] }
 0x1d1   : > { %v2476_v0 = vpack.c.bf16 %v2449_v12, %v2448_v58 }
 0x1d3   : > { %3318 = vmatprep.mubr.msk.bf16.mxu1 %vm2182_vm10, %v2476_v0 }
 0x1d4   : > { %3319 = vmatmul.mubr.msk.bf16.gmra.mrb[8].mxu1 %vm2182_vm10, %v2477_v52 }
 0x1e9   : > { %v3288_v48 = vpop.f32.mrb[12].mxu0 }
 0x1ea   : > { %v2370_v41 = vadd.f32 %v3288_v48, %v4782_v18  ;;  %v2361_v33 = vpop.f32.mrb[13].mxu0 }
 0x1eb   : > { %v2362_v21 = vadd.f32 %v4782_v18, %v2361_v33  ;;  %v3289_v36 = vpop.f32.mrb[14].mxu0 }
 0x1ec   : > { %v2373_v35 = vadd.f32 %v3289_v36, %v4782_v18  ;;  %v2364_v2 = vpop.f32.mrb[15].mxu0  ;;  %v2454_v28 = vmax.f32 %v2370_v41, 0.0 }
 0x1ed   : > { %v2365_v40 = vadd.f32 %v4782_v18, %v2364_v2  ;;  %v2452_v4 = vmax.f32 %v2362_v21, 0.0 }
 0x1ee   : > { %v2455_v7 = vmax.f32 %v2373_v35, 0.0 }
 0x1ef   : > { %v2453_v26 = vmax.f32 %v2365_v40, 0.0 }
 0x1f0   : > { %v2479_v10 = vpack.c.bf16 %v2455_v7, %v2454_v28 }
 0x1f1   : > { %v2478_v47 = vpack.c.bf16 %v2453_v26, %v2452_v4 }
 0x1f3   : > { %3322 = vmatprep.mubr.msk.bf16.mxu1 %vm2182_vm10, %v2478_v47 }
 0x1f4   : > { %3323 = vmatmul.mubr.msk.bf16.gmra.mrb[12].mxu1 %vm2182_vm10, %v2479_v10 }
 0x209   : > { %v3292_v45 = vpop.f32.mrb[16].mxu0 }
 0x20a   : > { %v2386_v62 = vadd.f32 %v3292_v45, %v4782_v18  ;;  %v2377_v49 = vpop.f32.mrb[17].mxu0 }
 0x20b   : > { %v2378_v38 = vadd.f32 %v4782_v18, %v2377_v49  ;;  %v3293_v34 = vpop.f32.mrb[18].mxu0 }
 0x20c   : > { %v2389_v42 = vadd.f32 %v3293_v34, %v4782_v18  ;;  %v2380_v19 = vpop.f32.mrb[19].mxu0  ;;  %v2458_v39 = vmax.f32 %v2386_v62, 0.0 }
 0x20d   : > { %v2381_v61 = vadd.f32 %v4782_v18, %v2380_v19  ;;  %v2456_v54 = vmax.f32 %v2378_v38, 0.0 }
 0x20e   : > { %v2459_v17 = vmax.f32 %v2389_v42, 0.0 }
 0x20f   : > { %v2457_v56 = vmax.f32 %v2381_v61, 0.0 }
 0x210   : > { %v2481_v44 = vpack.c.bf16 %v2459_v17, %v2458_v39 }
 0x211   : > { %v2480_v46 = vpack.c.bf16 %v2457_v56, %v2456_v54 }
 0x213   : > { %3326 = vmatprep.mubr.msk.bf16.mxu1 %vm2182_vm10, %v2480_v46 }
 0x214   : > { %3327 = vmatmul.mubr.msk.bf16.gmra.mrb[16].mxu1 %vm2182_vm10, %v2481_v44 }
 0x229   : > { %v3296_v60 = vpop.f32.mrb[20].mxu0 }
 0x22a   : > { %v2402_v20 = vadd.f32 %v3296_v60, %v4782_v18  ;;  %v2393_v13 = vpop.f32.mrb[21].mxu0 }
 0x22b   : > { %v2394_v32 = vadd.f32 %v4782_v18, %v2393_v13  ;;  %v3297_v23 = vpop.f32.mrb[22].mxu0 }
 0x22c   : > { %v2405_v55 = vadd.f32 %v3297_v23, %v4782_v18  ;;  %v2396_v3 = vpop.f32.mrb[23].mxu0  ;;  %v2462_v5 = vmax.f32 %v2402_v20, 0.0 }
 0x22d   : > { %v2397_v31 = vadd.f32 %v4782_v18, %v2396_v3  ;;  %v2460_v14 = vmax.f32 %v2394_v32, 0.0 }
 0x22e   : > { %v2463_v50 = vmax.f32 %v2405_v55, 0.0 }
 0x22f   : > { %v2461_v6 = vmax.f32 %v2397_v31, 0.0 }
 0x230   : > { %v2483_v25 = vpack.c.bf16 %v2463_v50, %v2462_v5 }
 0x231   : > { %v2482_v27 = vpack.c.bf16 %v2461_v6, %v2460_v14 }
 0x233   : > { %3330 = vmatprep.mubr.msk.bf16.mxu1 %vm2182_vm10, %v2482_v27 }
 0x234   : > { %3331 = vmatmul.mubr.msk.bf16.gmra.mrb[20].mxu1 %vm2182_vm10, %v2483_v25 }
 0x249   : > { %v3300_v63 = vpop.f32.mrb[24].mxu0 }
 0x24a   : > { %v2418_v11 = vadd.f32 %v3300_v63, %v4782_v18  ;;  %v2409_v59 = vpop.f32.mrb[25].mxu0 }
 0x24b   : > { %v2410_v53 = vadd.f32 %v4782_v18, %v2409_v59  ;;  %v3301_v24 = vpop.f32.mrb[26].mxu0 }
 0x24c   : > { %v2421_v16 = vadd.f32 %v3301_v24, %v4782_v18  ;;  %v2412_v15 = vpop.f32.mrb[27].mxu0  ;;  %v2466_v37 = vmax.f32 %v2418_v11, 0.0 }
 0x24d   : > { %v2413_v8 = vadd.f32 %v4782_v18, %v2412_v15  ;;  %v2464_v29 = vmax.f32 %v2410_v53, 0.0 }
 0x24e   : > { %v2467_v9 = vmax.f32 %v2421_v16, 0.0 }
 0x24f   : > { %v2465_v51 = vmax.f32 %v2413_v8, 0.0 }
 0x250   : > { %v2485_v43 = vpack.c.bf16 %v2467_v9, %v2466_v37 }
 0x251   : > { %v2484_v1 = vpack.c.bf16 %v2465_v51, %v2464_v29 }
 0x253   : > { %3334 = vmatprep.mubr.msk.bf16.mxu1 %vm2182_vm10, %v2484_v1 }
 0x254   : > { %3335 = vmatmul.mubr.msk.bf16.gmra.mrb[24].mxu1 %vm2182_vm10, %v2485_v43 }
 0x266   : > { %v3304_v57 = vpop.f32.mrb[28].mxu0 }
 0x267   : > { %v2434_v22 = vadd.f32 %v3304_v57, %v4782_v18  ;;  %v2425_v58 = vpop.f32.mrb[29].mxu0  ;;  %v3312_v12 = vpop.f32.mrb[0].mxu1 }
 0x268   : > { %v2426_v52 = vadd.f32 %v4782_v18, %v2425_v58  ;;  %v3305_v0 = vpop.f32.mrb[30].mxu0  ;;  %v2593_v48 = vpop.f32.mrb[1].mxu1  ;;  %v2602_v41 = vadd.f32 %v3312_v12, %v4849_v30 }
 0x269   : > { %v2437_v33 = vadd.f32 %v3305_v0, %v4782_v18  ;;  %v2594_v21 = vadd.f32 %v4849_v30, %v2593_v48  ;;  %v2428_v36 = vpop.f32.mrb[31].mxu0  ;;  %v3313_v35 = vpop.f32.mrb[2].mxu1  ;;  %v2470_v2 = vmax.f32 %v2434_v22, 0.0 }
 0x26a   : > { %v2429_v40 = vadd.f32 %v4782_v18, %v2428_v36  ;;  %v2596_v28 = vpop.f32.mrb[3].mxu1  ;;  %v2605_v26 = vadd.f32 %v3313_v35, %v4849_v30  ;;  %v2468_v47 = vmax.f32 %v2426_v52, 0.0  ;;  %v2722_v62 = vmax.f32 %v2602_v41, 0.0 }
 0x26b   : > { %v2471_v7 = vmax.f32 %v2437_v33, 0.0  ;;  %v2720_v4 = vmax.f32 %v2594_v21, 0.0  ;;  %v2597_v10 = vadd.f32 %v4849_v30, %v2596_v28 }
 0x26c   : > { %v2469_v45 = vmax.f32 %v2429_v40, 0.0  ;;  %v2723_v19 = vmax.f32 %v2605_v26, 0.0  ;;  %v2756_v39 = vsel %vm2752_vm12, %v2722_v62, 0.0 }
 0x26d   : > { %v2487_v49 = vpack.c.bf16 %v2471_v7, %v2470_v2  ;;  %v2721_v38 = vmax.f32 %v2597_v10, 0.0  ;;  %v2753_v42 = vsel %vm2752_vm12, %v2720_v4, 0.0 }
 0x26e   : > { %v2486_v34 = vpack.c.bf16 %v2469_v45, %v2468_v47  ;;  %v2758_v54 = vsel %vm2752_vm12, %v2723_v19, 0.0 }
 0x26f   : > { %v2754_v61 = vsel %vm2752_vm12, %v2721_v38, 0.0 }
 0x270   : > { %v2755_v18 = vadd.f32 %v2754_v61, %v2753_v42  ;;  %3338 = vmatprep.mubr.msk.bf16.mxu1 %vm2182_vm10, %v2486_v34 }
 0x271   : > { %3339 = vmatmul.mubr.msk.bf16.gmra.mrb[28].mxu1 %vm2182_vm10, %v2487_v49 }
 0x272   : > { %v2757_v17 = vadd.f32 %v2756_v39, %v2755_v18 }
 0x274   : > { %v2759_v56 = vadd.f32 %v2758_v54, %v2757_v17 }
 0x287   : > { %v3316_v44 = vpop.f32.mrb[4].mxu1 }
 0x288   : > { %v2609_v46 = vpop.f32.mrb[5].mxu1  ;;  %v2618_v60 = vadd.f32 %v3316_v44, %v4849_v30 }
 0x289   : > { %v2610_v20 = vadd.f32 %v4849_v30, %v2609_v46  ;;  %v3317_v13 = vpop.f32.mrb[6].mxu1 }
 0x28a   : > { %v2612_v32 = vpop.f32.mrb[7].mxu1  ;;  %v2621_v55 = vadd.f32 %v3317_v13, %v4849_v30  ;;  %v2726_v31 = vmax.f32 %v2618_v60, 0.0 }
 0x28b   : > { %v2724_v23 = vmax.f32 %v2610_v20, 0.0  ;;  %v2613_v3 = vadd.f32 %v4849_v30, %v2612_v32 }
 0x28c   : > { %v2727_v6 = vmax.f32 %v2621_v55, 0.0  ;;  %v2764_v63 = vsel %vm2752_vm12, %v2726_v31, 0.0 }
 0x28d   : > { %v2760_v5 = vsel %vm2752_vm12, %v2724_v23, 0.0  ;;  %v2725_v50 = vmax.f32 %v2613_v3, 0.0 }
 0x28e   : > { %v2761_v14 = vadd.f32 %v2760_v5, %v2759_v56  ;;  %v2766_v59 = vsel %vm2752_vm12, %v2727_v6, 0.0 }
 0x28f   : > { %v2762_v25 = vsel %vm2752_vm12, %v2725_v50, 0.0 }
 0x290   : > { %v2763_v27 = vadd.f32 %v2762_v25, %v2761_v14 }
 0x292   : > { %v2765_v11 = vadd.f32 %v2764_v63, %v2763_v27 }
 0x294   : > { %v2767_v53 = vadd.f32 %v2766_v59, %v2765_v11 }
 0x2a7   : > { %v3320_v24 = vpop.f32.mrb[8].mxu1 }
 0x2a8   : > { %v2625_v16 = vpop.f32.mrb[9].mxu1  ;;  %v2634_v15 = vadd.f32 %v3320_v24, %v4849_v30 }
 0x2a9   : > { %v2626_v8 = vadd.f32 %v4849_v30, %v2625_v16  ;;  %v3321_v37 = vpop.f32.mrb[10].mxu1 }
 0x2aa   : > { %v2628_v9 = vpop.f32.mrb[11].mxu1  ;;  %v2637_v51 = vadd.f32 %v3321_v37, %v4849_v30  ;;  %v2730_v1 = vmax.f32 %v2634_v15, 0.0 }
 0x2ab   : > { %v2728_v29 = vmax.f32 %v2626_v8, 0.0  ;;  %v2629_v43 = vadd.f32 %v4849_v30, %v2628_v9 }
 0x2ac   : > { %v2731_v12 = vmax.f32 %v2637_v51, 0.0  ;;  %v2772_v48 = vsel %vm2752_vm12, %v2730_v1, 0.0 }
 0x2ad   : > { %v2768_v57 = vsel %vm2752_vm12, %v2728_v29, 0.0  ;;  %v2729_v22 = vmax.f32 %v2629_v43, 0.0 }
 0x2ae   : > { %v2769_v58 = vadd.f32 %v2768_v57, %v2767_v53  ;;  %v2774_v33 = vsel %vm2752_vm12, %v2731_v12, 0.0 }
 0x2af   : > { %v2770_v52 = vsel %vm2752_vm12, %v2729_v22, 0.0 }
 0x2b0   : > { %v2771_v0 = vadd.f32 %v2770_v52, %v2769_v58 }
 0x2b2   : > { %v2773_v41 = vadd.f32 %v2772_v48, %v2771_v0 }
 0x2b4   : > { %v2775_v21 = vadd.f32 %v2774_v33, %v2773_v41 }
 0x2c7   : > { %v3324_v36 = vpop.f32.mrb[12].mxu1 }
 0x2c8   : > { %v2641_v35 = vpop.f32.mrb[13].mxu1  ;;  %v2650_v2 = vadd.f32 %v3324_v36, %v4849_v30 }
 0x2c9   : > { %v2642_v40 = vadd.f32 %v4849_v30, %v2641_v35  ;;  %v3325_v28 = vpop.f32.mrb[14].mxu1 }
 0x2ca   : > { %v2644_v7 = vpop.f32.mrb[15].mxu1  ;;  %v2653_v26 = vadd.f32 %v3325_v28, %v4849_v30  ;;  %v2734_v47 = vmax.f32 %v2650_v2, 0.0 }
 0x2cb   : > { %v2732_v4 = vmax.f32 %v2642_v40, 0.0  ;;  %v2645_v10 = vadd.f32 %v4849_v30, %v2644_v7 }
 0x2cc   : > { %v2735_v38 = vmax.f32 %v2653_v26, 0.0  ;;  %v2780_v19 = vsel %vm2752_vm12, %v2734_v47, 0.0 }
 0x2cd   : > { %v2776_v45 = vsel %vm2752_vm12, %v2732_v4, 0.0  ;;  %v2733_v62 = vmax.f32 %v2645_v10, 0.0 }
 0x2ce   : > { %v2777_v49 = vadd.f32 %v2776_v45, %v2775_v21  ;;  %v2782_v18 = vsel %vm2752_vm12, %v2735_v38, 0.0 }
 0x2cf   : > { %v2778_v34 = vsel %vm2752_vm12, %v2733_v62, 0.0 }
 0x2d0   : > { %v2779_v42 = vadd.f32 %v2778_v34, %v2777_v49 }
 0x2d2   : > { %v2781_v61 = vadd.f32 %v2780_v19, %v2779_v42 }
 0x2d4   : > { %v2783_v39 = vadd.f32 %v2782_v18, %v2781_v61 }
 0x2e7   : > { %v3328_v17 = vpop.f32.mrb[16].mxu1 }
 0x2e8   : > { %v2657_v54 = vpop.f32.mrb[17].mxu1  ;;  %v2666_v56 = vadd.f32 %v3328_v17, %v4849_v30 }
 0x2e9   : > { %v2658_v44 = vadd.f32 %v4849_v30, %v2657_v54  ;;  %v3329_v46 = vpop.f32.mrb[18].mxu1 }
 0x2ea   : > { %v2660_v60 = vpop.f32.mrb[19].mxu1  ;;  %v2669_v13 = vadd.f32 %v3329_v46, %v4849_v30  ;;  %v2738_v23 = vmax.f32 %v2666_v56, 0.0 }
 0x2eb   : > { %v2736_v20 = vmax.f32 %v2658_v44, 0.0  ;;  %v2661_v32 = vadd.f32 %v4849_v30, %v2660_v60 }
 0x2ec   : > { %v2739_v5 = vmax.f32 %v2669_v13, 0.0  ;;  %v2788_v6 = vsel %vm2752_vm12, %v2738_v23, 0.0 }
 0x2ed   : > { %v2784_v55 = vsel %vm2752_vm12, %v2736_v20, 0.0  ;;  %v2737_v3 = vmax.f32 %v2661_v32, 0.0 }
 0x2ee   : > { %v2785_v31 = vadd.f32 %v2784_v55, %v2783_v39  ;;  %v2790_v27 = vsel %vm2752_vm12, %v2739_v5, 0.0 }
 0x2ef   : > { %v2786_v50 = vsel %vm2752_vm12, %v2737_v3, 0.0 }
 0x2f0   : > { %v2787_v14 = vadd.f32 %v2786_v50, %v2785_v31 }
 0x2f2   : > { %v2789_v25 = vadd.f32 %v2788_v6, %v2787_v14 }
 0x2f4   : > { %v2791_v63 = vadd.f32 %v2790_v27, %v2789_v25 }
 0x307   : > { %v3332_v11 = vpop.f32.mrb[20].mxu1 }
 0x308   : > { %v2673_v59 = vpop.f32.mrb[21].mxu1  ;;  %v2682_v53 = vadd.f32 %v3332_v11, %v4849_v30 }
 0x309   : > { %v2674_v24 = vadd.f32 %v4849_v30, %v2673_v59  ;;  %v3333_v16 = vpop.f32.mrb[22].mxu1 }
 0x30a   : > { %v2676_v15 = vpop.f32.mrb[23].mxu1  ;;  %v2685_v37 = vadd.f32 %v3333_v16, %v4849_v30  ;;  %v2742_v29 = vmax.f32 %v2682_v53, 0.0 }
 0x30b   : > { %v2740_v8 = vmax.f32 %v2674_v24, 0.0  ;;  %v2677_v9 = vadd.f32 %v4849_v30, %v2676_v15 }
 0x30c   : > { %v2743_v57 = vmax.f32 %v2685_v37, 0.0  ;;  %v2796_v12 = vsel %vm2752_vm12, %v2742_v29, 0.0 }
 0x30d   : > { %v2792_v51 = vsel %vm2752_vm12, %v2740_v8, 0.0  ;;  %v2741_v43 = vmax.f32 %v2677_v9, 0.0 }
 0x30e   : > { %v2793_v1 = vadd.f32 %v2792_v51, %v2791_v63  ;;  %v2798_v0 = vsel %vm2752_vm12, %v2743_v57, 0.0 }
 0x30f   : > { %v2794_v22 = vsel %vm2752_vm12, %v2741_v43, 0.0 }
 0x310   : > { %v2795_v58 = vadd.f32 %v2794_v22, %v2793_v1 }
 0x312   : > { %v2797_v52 = vadd.f32 %v2796_v12, %v2795_v58 }
 0x314   : > { %v2799_v48 = vadd.f32 %v2798_v0, %v2797_v52 }
 0x327   : > { %v3336_v41 = vpop.f32.mrb[24].mxu1 }
 0x328   : > { %v2689_v33 = vpop.f32.mrb[25].mxu1  ;;  %v2698_v21 = vadd.f32 %v3336_v41, %v4849_v30 }
 0x329   : > { %v2690_v36 = vadd.f32 %v4849_v30, %v2689_v33  ;;  %v3337_v35 = vpop.f32.mrb[26].mxu1 }
 0x32a   : > { %v2692_v2 = vpop.f32.mrb[27].mxu1  ;;  %v2701_v28 = vadd.f32 %v3337_v35, %v4849_v30  ;;  %v2746_v4 = vmax.f32 %v2698_v21, 0.0 }
 0x32b   : > { %v2744_v40 = vmax.f32 %v2690_v36, 0.0  ;;  %v2693_v7 = vadd.f32 %v4849_v30, %v2692_v2 }
 0x32c   : > { %v2747_v45 = vmax.f32 %v2701_v28, 0.0  ;;  %v2804_v38 = vsel %vm2752_vm12, %v2746_v4, 0.0 }
 0x32d   : > { %v2800_v26 = vsel %vm2752_vm12, %v2744_v40, 0.0  ;;  %v2745_v10 = vmax.f32 %v2693_v7, 0.0 }
 0x32e   : > { %v2801_v47 = vadd.f32 %v2800_v26, %v2799_v48  ;;  %v2806_v42 = vsel %vm2752_vm12, %v2747_v45, 0.0 }
 0x32f   : > { %v2802_v62 = vsel %vm2752_vm12, %v2745_v10, 0.0 }
 0x330   : > { %v2803_v49 = vadd.f32 %v2802_v62, %v2801_v47 }
 0x332   : > { %v2805_v34 = vadd.f32 %v2804_v38, %v2803_v49 }
 0x334   : > { %v2807_v19 = vadd.f32 %v2806_v42, %v2805_v34 }
 0x344   : > { %v3340_v61 = vpop.f32.mrb[28].mxu1 }
 0x345   : > { %v2705_v18 = vpop.f32.mrb[29].mxu1  ;;  %v2714_v39 = vadd.f32 %v3340_v61, %v4849_v30 }
 0x346   : > { %v2706_v17 = vadd.f32 %v4849_v30, %v2705_v18  ;;  %v3341_v54 = vpop.f32.mrb[30].mxu1 }
 0x347   : > { %v2708_v56 = vpop.f32.mrb[31].mxu1  ;;  %v2717_v46 = vadd.f32 %v3341_v54, %v4849_v30  ;;  %v2750_v20 = vmax.f32 %v2714_v39, 0.0 }
 0x348   : > { %v2748_v44 = vmax.f32 %v2706_v17, 0.0  ;;  %v2709_v60 = vadd.f32 %v4849_v30, %v2708_v56 }
 0x349   : > { %v2751_v55 = vmax.f32 %v2717_v46, 0.0  ;;  %v2812_v5 = vsel %vm2752_vm12, %v2750_v20, 0.0 }
 0x34a   : > { %v2808_v13 = vsel %vm2752_vm12, %v2748_v44, 0.0  ;;  %v2749_v32 = vmax.f32 %v2709_v60, 0.0 }
 0x34b   : > { %v2809_v23 = vadd.f32 %v2808_v13, %v2807_v19  ;;  %v2814_v14 = vsel %vm2752_vm12, %v2751_v55, 0.0 }
 0x34c   : > { %v2810_v3 = vsel %vm2752_vm12, %v2749_v32, 0.0 }
 0x34d   : > { %v2811_v31 = vadd.f32 %v2810_v3, %v2809_v23 }
 0x34f   : > { %v2813_v50 = vadd.f32 %v2812_v5, %v2811_v31 }
 0x351   : > { %v2815_v6 = vadd.f32 %v2814_v14, %v2813_v50 }
 0x353   : > { %v2816_v25 = vrot.slane %v2815_v6, 4 }
 0x355   : > { %v2817_v30 = vadd.f32 %v2816_v25, %v2815_v6 }
 0x357   : > { %v2818_v27 = vrot.slane %v2817_v30, 2 }
 0x359   : > { %v2819_v63 = vadd.f32 %v2818_v27, %v2817_v30 }
 0x35b   : > { %v2820_v11 = vrot.slane %v2819_v63, 1 }
 0x35d   : > { %v2821_v59 = vadd.f32 %v2820_v11, %v2819_v63 }
 0x35f   : > { %2823 = vst.msk [vmem:[%s240_s29] sm:$0x1] %vm2822_vm13, %v2821_v59 }
 0x360   : > { %3569 = shalt.err (!%p3566_p5)
}
 0x361   : > { %s3570_s11 = scalar_lea.hbm %s4926_s10, 16  ;;  %s3574_s24 = scalar_lea.hbm %s4978_s5, 32 }
 0x362   : > { %p3571_p6 = scmp.ne.s32.totalorder %s4926_s10, %s3570_s11  ;;  %p3575_p10 = scmp.lt.u32.totalorder %s4926_s10, %s4978_s5 }
 0x363   : > { %p3576_p11 = scmp.lt.u32.totalorder %s3574_s24, %s3570_s11  ;;  %p3578_p13 = scmp.lt.u32.totalorder %s3570_s11, %s4926_s10 }
 0x364   : > { %p3572_p7 = pnand %p3571_p6, %p3715_p4 }
 0x365   : > { %p3577_p12 = por %p3576_p11, %p3575_p10 }
 0x366   : > { %p3573_p9 = pneg %p3572_p7 }
 0x367   : > { %p3579_p0 = por %p3578_p13, %p3577_p12 }
 0x369   : > { %p3580_p1 = pnand %p3579_p0, %p3573_p9 }
 0x36b   : > { %3583 = shalt.err (!%p3580_p1)
}
 0x36c   : > { %3344 = dma.vmem_to_hbm [thread:$0]  (%p3715_p4), %s4928_s7, 16, %s4926_s10, %s2825_s14  }
 0x36d PF: > { %p3350_p2 = scmp.ge.s32.totalorder %s3634_s23, 2  ;;  %s2850_s29 = sand.u32 1, %s3614_s18  }
 0x36e   : > { %s2851_s8 = scalar_lea.sflag [#allocation3], %s2850_s29 }
 0x36f   : > { %p3347_p3 = pnand %p3350_p2, %p3722_p8 }
 0x371   : > { %3609 = dma.done.wait (!%p3347_p3), %s2851_s8, 16  }
 0x372   : > { %3611 = vsyncadd (!%p3347_p3), %s2851_s8, 4294967280  ;;  %s18_s23 = sadd.s32 1, %s3634_s23   ;;  %s4981_s18 = smov %s3618_s19 }
 0x373   : > { %p15_p5 = scmp.ge.s32.totalorder %s18_s23, 4   ;;  %s4982_s19 = smov %s3622_s20 }
 0x374   : > { %s4983_s20 = smov %s3728_s6  ;;  %s4984_s21 = smov %s3630_s22 }
 0x375   : > { %s4985_s22 = smov %s4987_s26  ;;  %17 = sbr.rel (!%p15_p5) target bundleno = 4 (0x4), region = 77 }
 0x37c   :  { %2855 = vsyncpa [#allocation3], 1 }
 0x37d   :  { %2857 = vsyncpa [#allocation3 + $0x1], 1 }

</bundles_post_ra>
